<compile_context>
chip_gen: v6e
topology: v6e:2x2x1
jax: 0.10.0
libtpu: 0.0.40
codegen_flags: <defaults>
</compile_context>

<pallas_src>
import jax
import jax.numpy as jnp
from jax.experimental import pallas as pl
from jax.experimental.pallas import tpu as pltpu


def _round_up(x, m):
    return ((x + m - 1) // m) * m


def _pick_batch_tile(B, cap=256):
    """Batch tile: multiple of 16, <= cap (roughly), minimal padding waste."""
    b16 = _round_up(max(B, 1), 16)
    if b16 <= cap:
        return b16                      # single batch tile
    n_tiles = pl.cdiv(B, cap)
    return _round_up(-(-B // n_tiles), 16)


# --------------------------------------------------------------------------
# Kernels
# --------------------------------------------------------------------------
def mlp3_kernel(x_ref, w1_ref, b1_ref, w2_ref, b2_ref, w3_ref, b3_ref, h3_ref):
    """Layers 1-3: bf16 MXU inputs, f32 accumulation, f32 bias+tanh."""
    h = jnp.tanh(
        jnp.dot(x_ref[...], w1_ref[...],
                preferred_element_type=jnp.float32) + b1_ref[...])
    h = jnp.tanh(
        jnp.dot(h.astype(jnp.bfloat16), w2_ref[...],
                preferred_element_type=jnp.float32) + b2_ref[...])
    h = jnp.tanh(
        jnp.dot(h.astype(jnp.bfloat16), w3_ref[...],
                preferred_element_type=jnp.float32) + b3_ref[...])
    h3_ref[...] = h.astype(h3_ref.dtype)


def layer4_kernel(h3_ref, w4_ref, b4_ref, o_ref):
    """Layer 4: one (bt, tn) output tile per grid step.  f32 tanh epilogue."""
    o = jnp.tanh(
        jnp.dot(h3_ref[...], w4_ref[...],
                preferred_element_type=jnp.float32) + b4_ref[...])
    o_ref[...] = o.astype(o_ref.dtype)


# --------------------------------------------------------------------------
# One-time parameter preparation (outside the hot path)
# --------------------------------------------------------------------------
def prepare_decoder_params(params, h, w, *, n_tile=None, n_tile_cap=2048):
    """Cast weights to bf16 / biases to f32 once and N-pad layer 4 to the
    chosen tile width (multiple of 128 -> lane-dense unmasked stores)."""
    opt_dim = 3 * h * w
    (w1, b1), (w2, b2), (w3, b3), (w4, b4) = params
    assert w4.shape[1] == opt_dim and b4.shape[1] == opt_dim

    if n_tile is None:
        tn = min(n_tile_cap, _round_up(opt_dim, 128))
    else:
        assert n_tile % 128 == 0
        tn = n_tile
    opt_dim_pad = _round_up(opt_dim, tn)

    w4p, b4p = w4, b4
    if opt_dim_pad != opt_dim:
        w4p = jnp.pad(w4, ((0, 0), (0, opt_dim_pad - opt_dim)))
        b4p = jnp.pad(b4, ((0, 0), (0, opt_dim_pad - opt_dim)))

    return dict(
        w1=w1.astype(jnp.bfloat16), b1=b1.astype(jnp.float32),
        w2=w2.astype(jnp.bfloat16), b2=b2.astype(jnp.float32),
        w3=w3.astype(jnp.bfloat16), b3=b3.astype(jnp.float32),
        w4=w4p.astype(jnp.bfloat16), b4=b4p.astype(jnp.float32),
        h=h, w=w, opt_dim=opt_dim, opt_dim_pad=opt_dim_pad, tn=tn,
    )


# --------------------------------------------------------------------------
# Forward pass (hot path: only pallas_calls + cheap view ops)
# --------------------------------------------------------------------------
def ff_forward_decoder(x, prep, *, batch_tile=None):
    """x: (B, b_n) float32.  Returns (B, 3, h, w) float32."""
    B, b_n = x.shape
    h, w = prep["h"], prep["w"]
    opt_dim, opt_dim_pad, tn = prep["opt_dim"], prep["opt_dim_pad"], prep["tn"]
    w1, b1 = prep["w1"], prep["b1"]
    w2, b2 = prep["w2"], prep["b2"]
    w3, b3 = prep["w3"], prep["b3"]
    w4, b4 = prep["w4"], prep["b4"]
    hid = w1.shape[1]
    assert w1.shape[0] == b_n

    bt = batch_tile if batch_tile is not None else _pick_batch_tile(B)
    assert bt % 16 == 0 and bt >= 16
    B_pad = _round_up(B, bt)
    nb = B_pad // bt
    nn = opt_dim_pad // tn

    xb = x.astype(jnp.bfloat16)
    if B_pad != B:
        xb = jnp.pad(xb, ((0, B_pad - B), (0, 0)))

    vmem_limit = 48 * 1024 * 1024
    full = lambda arr: pl.BlockSpec(arr.shape, lambda i: (0, 0))

    # ---- Call 1: layers 1-3, grid over batch tiles only ---------------------
    h3 = pl.pallas_call(
        mlp3_kernel,
        out_shape=jax.ShapeDtypeStruct((B_pad, hid), jnp.bfloat16),
        grid_spec=pltpu.PrefetchScalarGridSpec(
            num_scalar_prefetch=0,
            grid=(nb,),
            in_specs=[
                pl.BlockSpec((bt, b_n), lambda i: (i, 0)),
                full(w1), full(b1),
                full(w2), full(b2),
                full(w3), full(b3),
            ],
            out_specs=pl.BlockSpec((bt, hid), lambda i: (i, 0)),
        ),
        compiler_params=pltpu.CompilerParams(
            dimension_semantics=("parallel",),
            vmem_limit_bytes=vmem_limit,
        ),
    )(xb, w1, b1, w2, b2, w3, b3)

    # ---- Call 2: layer 4 as a pure GEMM+tanh --------------------------------
    # Grid order: N tiles OUTER, batch tiles INNER -> the w4/b4 block index is
    # constant across consecutive inner steps, so each w4 tile is DMA'd once.
    # Both axes are independent -> "parallel" (megacore can shard N tiles).
    out = pl.pallas_call(
        layer4_kernel,
        out_shape=jax.ShapeDtypeStruct((B_pad, opt_dim_pad), jnp.float32),
        grid_spec=pltpu.PrefetchScalarGridSpec(
            num_scalar_prefetch=0,
            grid=(nn, nb),
            in_specs=[
                pl.BlockSpec((bt, hid), lambda j, i: (i, 0)),
                pl.BlockSpec((hid, tn), lambda j, i: (0, j)),
                pl.BlockSpec((1, tn), lambda j, i: (0, j)),
            ],
            out_specs=pl.BlockSpec((bt, tn), lambda j, i: (i, j)),
        ),
        compiler_params=pltpu.CompilerParams(
            dimension_semantics=("parallel", "parallel"),
            vmem_limit_bytes=vmem_limit,
        ),
    )(h3, w4, b4)

    if B_pad != B or opt_dim_pad != opt_dim:
        out = out[:B, :opt_dim]
    return out.reshape(B, 3, h, w)


# --------------------------------------------------------------------------
# Init + references
# --------------------------------------------------------------------------
def init_params(key, b_n, opt_dim):
    """PyTorch-style Linear init: U(-1/sqrt(fan_in), 1/sqrt(fan_in)).
    Weights stored as (in_features, out_features)."""
    dims = [(b_n, 512), (512, 512), (512, 512), (512, opt_dim)]
    params = []
    for fan_in, fan_out in dims:
        key, kw, kb = jax.random.split(key, 3)
        bound = 1.0 / jnp.sqrt(fan_in)
        W = jax.random.uniform(kw, (fan_in, fan_out), jnp.float32, -bound, bound)
        b = jax.random.uniform(kb, (1, fan_out), jnp.float32, -bound, bound)
        params.append((W, b))
    return params


def reference_forward_f32(x, params, h, w):
    out = x
    for W, b in params:
        out = jnp.tanh(out @ W + b)
    return out.reshape(-1, 3, h, w)


def reference_forward_bf16(x, params, h, w):
    """Same bf16-matmul / f32-accumulate recipe as the kernel."""
    out = x
    for W, b in params:
        out = jnp.tanh(
            jnp.dot(out.astype(jnp.bfloat16), W.astype(jnp.bfloat16),
                    preferred_element_type=jnp.float32) + b)
    return out.reshape(-1, 3, h, w)


if __name__ == "__main__":
    # Patch (h, w) = (16, 16) -> opt_dim = 768, b_n = 32, batch 50 (exercises
    # batch padding to 64 and, in one config below, multiple batch tiles).
    H, W_ = 16, 16
    B_N = 32
    BATCH = 50
    OPT_DIM = 3 * H * W_

    key = jax.random.PRNGKey(0)
    key, kx = jax.random.split(key)
    x = jax.random.normal(kx, (BATCH, B_N), jnp.float32)
    params = init_params(key, B_N, OPT_DIM)

    y_ref_f32 = reference_forward_f32(x, params, H, W_)
    y_ref_bf16 = reference_forward_bf16(x, params, H, W_)

    # Configs: default (single N tile / single batch tile), multi-N-tile
    # (exercises the N-outer grid order and w4 tiling), and multi-batch-tile.
    for n_tile, batch_tile in ((None, None), (256, None), (128, 16)):
        prep = prepare_decoder_params(params, H, W_, n_tile=n_tile)
        y = ff_forward_decoder(x, prep, batch_tile=batch_tile)
        y = jax.block_until_ready(y)

        assert y.shape == (BATCH, 3, H, W_), y.shape
        # bf16 MXU inputs loosen the match vs. the pure-f32 reference.
        assert jnp.allclose(y, y_ref_f32, atol=4e-2, rtol=0.0), \
            float(jnp.max(jnp.abs(y - y_ref_f32)))
        # Against a reference using the same bf16/f32 recipe, the match is tight.
        assert jnp.allclose(y, y_ref_bf16, atol=2e-3, rtol=0.0), \
            float(jnp.max(jnp.abs(y - y_ref_bf16)))

    # Odd patch size: opt_dim = 3*13*13 = 507, not a multiple of 128 ->
    # N-padded to 512 (lane-dense stores), padding sliced off in the wrapper.
    H2, W2 = 13, 13
    OPT2 = 3 * H2 * W2
    params2 = init_params(jax.random.PRNGKey(1), B_N, OPT2)
    y2_ref = reference_forward_bf16(x, params2, H2, W2)
    prep2 = prepare_decoder_params(params2, H2, W2)
    y2 = jax.block_until_ready(ff_forward_decoder(x, prep2))
    assert y2.shape == (BATCH, 3, H2, W2), y2.shape
    assert jnp.allclose(y2, y2_ref, atol=2e-3, rtol=0.0), \
        float(jnp.max(jnp.abs(y2 - y2_ref)))

    # TODO(synk): optional bf16 tanh epilogue on v6e/v7x (bf16 EUP) if a bundle
    # dump shows the EUP slot binding; kept f32 here for v5e parity/accuracy.
    print("KERNEL_OK")
</pallas_src>

<mosaic_0001>
module attributes {stable_mosaic.version = 11 : i64} {
  func.func @mlp3_kernel(%arg0: i32, %arg1: memref<64x32xbf16, #tpu.memory_space<vmem>>, %arg2: memref<32x512xbf16, #tpu.memory_space<vmem>>, %arg3: memref<1x512xf32, #tpu.memory_space<vmem>>, %arg4: memref<512x512xbf16, #tpu.memory_space<vmem>>, %arg5: memref<1x512xf32, #tpu.memory_space<vmem>>, %arg6: memref<512x512xbf16, #tpu.memory_space<vmem>>, %arg7: memref<1x512xf32, #tpu.memory_space<vmem>>, %arg8: memref<64x512xbf16, #tpu.memory_space<vmem>>) attributes {dimension_semantics = [#tpu.dimension_semantics<parallel>], iteration_bounds = array<i64: 1>, scalar_prefetch = 0 : i64, scratch_operands = 0 : i64, tpu.core_type = #tpu.core_type<tc>, window_params = [{transform_indices = @transform_0, window_bounds = array<i64: 64, 32>}, {pipeline_mode = #tpu.pipeline_mode<synchronous>, transform_indices = @transform_1, window_bounds = array<i64: 32, 512>}, {pipeline_mode = #tpu.pipeline_mode<synchronous>, transform_indices = @transform_2, window_bounds = array<i64: 1, 512>}, {pipeline_mode = #tpu.pipeline_mode<synchronous>, transform_indices = @transform_3, window_bounds = array<i64: 512, 512>}, {pipeline_mode = #tpu.pipeline_mode<synchronous>, transform_indices = @transform_4, window_bounds = array<i64: 1, 512>}, {pipeline_mode = #tpu.pipeline_mode<synchronous>, transform_indices = @transform_5, window_bounds = array<i64: 512, 512>}, {pipeline_mode = #tpu.pipeline_mode<synchronous>, transform_indices = @transform_6, window_bounds = array<i64: 1, 512>}, {transform_indices = @transform_7, window_bounds = array<i64: 64, 512>}]} {
    %c0 = arith.constant 0 : index
    %c0_0 = arith.constant 0 : index
    %0 = vector.load %arg1[%c0, %c0_0] : memref<64x32xbf16, #tpu.memory_space<vmem>>, vector<64x32xbf16>
    %c0_1 = arith.constant 0 : index
    %c0_2 = arith.constant 0 : index
    %1 = vector.load %arg2[%c0_1, %c0_2] : memref<32x512xbf16, #tpu.memory_space<vmem>>, vector<32x512xbf16>
    %cst = arith.constant dense<0.000000e+00> : vector<64x512xf32>
    %2 = tpu.matmul %0, %1, %cst {dimension_numbers = #tpu.dot_dimension_numbers<[1], [0], [0], [1], [0, 0, 1, 1], [], []>} : vector<64x32xbf16>, vector<32x512xbf16>, vector<64x512xf32> -> vector<64x512xf32>
    %c0_3 = arith.constant 0 : index
    %c0_4 = arith.constant 0 : index
    %3 = vector.load %arg3[%c0_3, %c0_4] : memref<1x512xf32, #tpu.memory_space<vmem>>, vector<1x512xf32>
    %4 = vector.broadcast %3 : vector<1x512xf32> to vector<64x512xf32>
    %5 = arith.addf %2, %4 : vector<64x512xf32>
    %6 = math.tanh %5 : vector<64x512xf32>
    %7 = arith.truncf %6 : vector<64x512xf32> to vector<64x512xbf16>
    %c0_5 = arith.constant 0 : index
    %c0_6 = arith.constant 0 : index
    %8 = vector.load %arg4[%c0_5, %c0_6] : memref<512x512xbf16, #tpu.memory_space<vmem>>, vector<512x512xbf16>
    %cst_7 = arith.constant dense<0.000000e+00> : vector<64x512xf32>
    %9 = tpu.matmul %7, %8, %cst_7 {dimension_numbers = #tpu.dot_dimension_numbers<[1], [0], [0], [1], [0, 0, 1, 1], [], []>} : vector<64x512xbf16>, vector<512x512xbf16>, vector<64x512xf32> -> vector<64x512xf32>
    %c0_8 = arith.constant 0 : index
    %c0_9 = arith.constant 0 : index
    %10 = vector.load %arg5[%c0_8, %c0_9] : memref<1x512xf32, #tpu.memory_space<vmem>>, vector<1x512xf32>
    %11 = vector.broadcast %10 : vector<1x512xf32> to vector<64x512xf32>
    %12 = arith.addf %9, %11 : vector<64x512xf32>
    %13 = math.tanh %12 : vector<64x512xf32>
    %14 = arith.truncf %13 : vector<64x512xf32> to vector<64x512xbf16>
    %c0_10 = arith.constant 0 : index
    %c0_11 = arith.constant 0 : index
    %15 = vector.load %arg6[%c0_10, %c0_11] : memref<512x512xbf16, #tpu.memory_space<vmem>>, vector<512x512xbf16>
    %cst_12 = arith.constant dense<0.000000e+00> : vector<64x512xf32>
    %16 = tpu.matmul %14, %15, %cst_12 {dimension_numbers = #tpu.dot_dimension_numbers<[1], [0], [0], [1], [0, 0, 1, 1], [], []>} : vector<64x512xbf16>, vector<512x512xbf16>, vector<64x512xf32> -> vector<64x512xf32>
    %c0_13 = arith.constant 0 : index
    %c0_14 = arith.constant 0 : index
    %17 = vector.load %arg7[%c0_13, %c0_14] : memref<1x512xf32, #tpu.memory_space<vmem>>, vector<1x512xf32>
    %18 = vector.broadcast %17 : vector<1x512xf32> to vector<64x512xf32>
    %19 = arith.addf %16, %18 : vector<64x512xf32>
    %20 = math.tanh %19 : vector<64x512xf32>
    %21 = arith.truncf %20 : vector<64x512xf32> to vector<64x512xbf16>
    %c0_15 = arith.constant 0 : index
    %c0_16 = arith.constant 0 : index
    %22 = vector.load %arg8[%c0_15, %c0_16] : memref<64x512xbf16, #tpu.memory_space<vmem>>, vector<64x512xbf16>
    tpu.vector_store %arg8[%c0_15, %c0_16], %21 {strides = array<i32>} : memref<64x512xbf16, #tpu.memory_space<vmem>>, vector<64x512xbf16>,
    return
  }
  func.func @transform_0(%arg0: i32) -> (i32, i32) {
    %c0_i32 = arith.constant 0 : i32
    %c0_i32_0 = arith.constant 0 : i32
    return %arg0, %c0_i32 : i32, i32
  }
  func.func @transform_1(%arg0: i32) -> (i32, i32) {
    %c0_i32 = arith.constant 0 : i32
    %c0_i32_0 = arith.constant 0 : i32
    %c0_i32_1 = arith.constant 0 : i32
    return %c0_i32, %c0_i32_0 : i32, i32
  }
  func.func @transform_2(%arg0: i32) -> (i32, i32) {
    %c0_i32 = arith.constant 0 : i32
    %c0_i32_0 = arith.constant 0 : i32
    %c0_i32_1 = arith.constant 0 : i32
    return %c0_i32, %c0_i32_0 : i32, i32
  }
  func.func @transform_3(%arg0: i32) -> (i32, i32) {
    %c0_i32 = arith.constant 0 : i32
    %c0_i32_0 = arith.constant 0 : i32
    %c0_i32_1 = arith.constant 0 : i32
    return %c0_i32, %c0_i32_0 : i32, i32
  }
  func.func @transform_4(%arg0: i32) -> (i32, i32) {
    %c0_i32 = arith.constant 0 : i32
    %c0_i32_0 = arith.constant 0 : i32
    %c0_i32_1 = arith.constant 0 : i32
    return %c0_i32, %c0_i32_0 : i32, i32
  }
  func.func @transform_5(%arg0: i32) -> (i32, i32) {
    %c0_i32 = arith.constant 0 : i32
    %c0_i32_0 = arith.constant 0 : i32
    %c0_i32_1 = arith.constant 0 : i32
    return %c0_i32, %c0_i32_0 : i32, i32
  }
  func.func @transform_6(%arg0: i32) -> (i32, i32) {
    %c0_i32 = arith.constant 0 : i32
    %c0_i32_0 = arith.constant 0 : i32
    %c0_i32_1 = arith.constant 0 : i32
    return %c0_i32, %c0_i32_0 : i32, i32
  }
  func.func @transform_7(%arg0: i32) -> (i32, i32) {
    %c0_i32 = arith.constant 0 : i32
    %c0_i32_0 = arith.constant 0 : i32
    return %arg0, %c0_i32 : i32, i32
  }
}

</mosaic_0001>

<bundles_post_ra>
// kernel: tpu_custom_call.1
= control target key start
LH: loop header
LB: loop body
LE: loop exit
PB: predicated region body
PF: predicated region fallthrough
CT: control target
= control target key end

     0   :  { %12 = vsyncpa [#allocation3], 0  ;;  %s4121_s0 = inlined_call_operand.vmem [shape: bf16[64,32], index: 0, kind: input, shape index: {}]   ;;  %s4122_s1 = inlined_call_operand.hbm [shape: bf16[32,512], index: 1, kind: input, shape index: {}]   ;;  %s4123_s2 = inlined_call_operand.vmem [shape: f32[1,512], index: 2, kind: input, shape index: {}]   ;;  %s4124_s3 = inlined_call_operand.hbm [shape: bf16[512,512], index: 3, kind: input, shape index: {}]   ;;  %s4125_s4 = inlined_call_operand.vmem [shape: f32[1,512], index: 4, kind: input, shape index: {}]   ;;  %s4126_s5 = inlined_call_operand.hbm [shape: bf16[512,512], index: 5, kind: input, shape index: {}]   ;;  %s4127_s6 = inlined_call_operand.vmem [shape: f32[1,512], index: 6, kind: input, shape index: {}]   ;;  %s4128_s7 = inlined_call_operand.hbm [shape: bf16[64,512], index: 7, kind: output, shape index: {}]  }
   0x1   :  { %13 = vsyncpa [#allocation6], 0 }
   0x2   :  { %14 = vsyncpa [#allocation4], 0  ;;  %s3741_s24 = smov [#allocation5]   ;;  %s3742_s26 = smov [#allocation2]  }
   0x3   :  { %s36_s25 = sshll.u32 %s3741_s24, 4  ;;  %s22_s27 = sshll.u32 %s3742_s26, 4  ;;  %s37_s25 = int_to_ptr.vmem [resolvable:$true] %s36_s25  ;;  %s23_s27 = int_to_ptr.vmem [resolvable:$true] %s22_s27 }
   0x4   :  { %s3663_s28 = scalar_lea.vmem %s37_s25, 16384  ;;  %p3668_p1 = scmp.lt.s32.totalorder %s37_s25, %s37_s25 }
   0x5   :  { %p3664_p0 = scmp.ne.s32.totalorder %s37_s25, %s3663_s28  ;;  %p3669_p2 = scmp.lt.s32.totalorder %s3663_s28, %s3663_s28 }
   0x7   :  { %p3670_p3 = por %p3669_p2, %p3668_p1 }
   0x9   :  { %p3671_p4 = pnand %p3670_p3, %p3664_p0 }
   0xb   :  { %3674 = shalt.err (!%p3671_p4)
}
   0xc   :  { %s3743_s29 = smov 256   ;;  %s3744_s30 = smov 16  }
   0xd   :  { %42 = dma.hbm_to_vmem [thread:$0]  %s4124_s3, 16384, %s37_s25, [#allocation6], %s3743_s29, %s3743_s29, %s3744_s30  }
   0xe   :  { %s3683_s10 = scalar_lea.vmem %s23_s27, 1024  ;;  %p3688_p6 = scmp.lt.s32.totalorder %s23_s27, %s23_s27 }
   0xf   :  { %p3684_p5 = scmp.ne.s32.totalorder %s23_s27, %s3683_s10  ;;  %p3689_p7 = scmp.lt.s32.totalorder %s3683_s10, %s3683_s10 }
  0x11   :  { %p3690_p8 = por %p3689_p7, %p3688_p6 }
  0x13   :  { %p3691_p9 = pnand %p3690_p8, %p3684_p5 }
  0x15   :  { %3694 = shalt.err (!%p3691_p9)
}
  0x16   :  { %28 = dma.hbm_to_vmem [thread:$0]  %s4122_s1, 1024, %s23_s27, [#allocation3], %s3743_s29, %s3743_s29, %s3744_s30  }
  0x17   :  { %s3745_s13 = smov [#allocation7]  }
  0x18   :  { %s50_s14 = sshll.u32 %s3745_s13, 4  ;;  %s51_s14 = int_to_ptr.vmem [resolvable:$true] %s50_s14 }
  0x19   :  { %s3703_s15 = scalar_lea.vmem %s51_s14, 16384  ;;  %p3708_p11 = scmp.lt.s32.totalorder %s51_s14, %s51_s14 }
  0x1a   :  { %p3704_p10 = scmp.ne.s32.totalorder %s51_s14, %s3703_s15  ;;  %p3709_p12 = scmp.lt.s32.totalorder %s3703_s15, %s3703_s15 }
  0x1c   :  { %p3710_p13 = por %p3709_p12, %p3708_p11 }
  0x1e   :  { %p3711_p0 = pnand %p3710_p13, %p3704_p10 }
  0x20   :  { %3714 = shalt.err (!%p3711_p0)
}
  0x21   :  { %56 = dma.hbm_to_vmem [thread:$0]  %s4126_s5, 16384, %s51_s14, [#allocation6], %s3743_s29, %s3743_s29, %s3744_s30  }
  0x22   :  { %3735 = dma.done.wait [#allocation3], 1024  }
  0x23   :  { %3736 = vsyncadd [#allocation3], 4294966272 }
  0x24   :  { %3737 = dma.done.wait [#allocation6], 32768  }
  0x25   :  { %3738 = vsyncadd [#allocation6], 4294934528  ;;  %v3746_v0 = vmov 0   ;;  %v3063_v1 = vld [vmem:[#allocation2 + $0x24] ss:$16 sps:$4 sm:$0xff]   ;;  %vm167_vm0 = vcmask 261120  }
  0x26   :  { %212 = vmatprep.mubr.bf16.mxu0 %v3746_v0  ;;  %285 = vmatprep.mubr.bf16.mxu1 %v3746_v0  ;;  %v3065_v2 = vld [vmem:[#allocation2 + $0x2c] ss:$16 sps:$4 sm:$0xff]   ;;  %v3067_v3 = vld [vmem:[#allocation2 + $0x20] ss:$16 sps:$4 sm:$0xff]   ;;  %v3068_v4 = vld [vmem:[#allocation2 + $0x28] ss:$16 sps:$4 sm:$0xff]  }
  0x27   :  { %192 = vmatprep.subr.bf16.mxu0 %v3063_v1  ;;  %265 = vmatprep.subr.bf16.mxu1 %v3065_v2  ;;  %v3069_v5 = vld [vmem:[#allocation2 + $0x4] ss:$16 sps:$4 sm:$0xff]   ;;  %v3071_v6 = vld [vmem:[#allocation2 + $0xc] ss:$16 sps:$4 sm:$0xff]   ;;  %v3073_v7 = vld [vmem:[#allocation2] ss:$16 sps:$4 sm:$0xff]  }
  0x28   :  { %193 = vmatpush1.bf16.msra.mxu0 %v3067_v3  ;;  %266 = vmatpush1.bf16.msra.mxu1 %v3068_v4  ;;  %v3074_v8 = vld [vmem:[#allocation2 + $0x8] ss:$16 sps:$4 sm:$0xff]   ;;  %v3075_v9 = vld [vmem:[%s4121_s0] sm:$0xff]   ;;  %v3077_v27 = vld [vmem:[%s4121_s0 + $0x10] sm:$0xff]  }
  0x29   :  { %194 = vmatprep.subr.bf16.mxu0 %v3069_v5  ;;  %267 = vmatprep.subr.bf16.mxu1 %v3071_v6  ;;  %v3079_v10 = vld [vmem:[#allocation5 + $0xe0] ss:$16 sps:$4 sm:$0xff]   ;;  %v3081_v11 = vld [vmem:[#allocation5 + $0xe4] ss:$16 sps:$4 sm:$0xff]   ;;  %v3076_v18 = vld [vmem:[%s4121_s0 + $0x8] sm:$0xff]  }
  0x2a   :  { %v3082_v12 = vld [vmem:[#allocation5 + $0x2e0] ss:$16 sps:$4 sm:$0xff]   ;;  %v3084_v13 = vld [vmem:[#allocation5 + $0x2e4] ss:$16 sps:$4 sm:$0xff]   ;;  %v3078_v36 = vld [vmem:[%s4121_s0 + $0x18] sm:$0xff]  }
  0x2b   :  { %v3085_v14 = vld [vmem:[#allocation5 + $0xc0] ss:$16 sps:$4 sm:$0xff]   ;;  %v3087_v15 = vld [vmem:[#allocation5 + $0xc4] ss:$16 sps:$4 sm:$0xff]  }
  0x2c   :  { %195 = vmatpush1.bf16.msra.mxu0 %v3073_v7  ;;  %268 = vmatpush1.bf16.msra.mxu1 %v3074_v8  ;;  %v3088_v16 = vld [vmem:[#allocation5 + $0x2c0] ss:$16 sps:$4 sm:$0xff]   ;;  %v3090_v17 = vld [vmem:[#allocation5 + $0x2c4] ss:$16 sps:$4 sm:$0xff]  }
  0x2d   :  { %1164 = vmatprep.subr.bf16.mxu0 %v3081_v11  ;;  %1237 = vmatprep.subr.bf16.mxu1 %v3084_v13  ;;  %v3093_v19 = vld [vmem:[#allocation5 + $0xa4] ss:$16 sps:$4 sm:$0xff]   ;;  %v3091_v21 = vld [vmem:[#allocation5 + $0xa0] ss:$16 sps:$4 sm:$0xff]   ;;  %v3177_v13 = vld [vmem:[#allocation5 + $0xec] ss:$16 sps:$4 sm:$0xff]  }
  0x2e   :  { %v3096_v20 = vld [vmem:[#allocation5 + $0x2a4] ss:$16 sps:$4 sm:$0xff]   ;;  %v3094_v22 = vld [vmem:[#allocation5 + $0x2a0] ss:$16 sps:$4 sm:$0xff]  }
  0x2f   :  { %2760 = vmatmul.mubr.msk.bf16.vlgmr.msra.gmra.mxu0 %vm167_vm0, %v3075_v9  ;;  %2764 = vmatmul.mubr.msk.bf16.vlgmr.msra.gmra.mxu1 %vm167_vm0, %v3075_v9  ;;  %v3099_v23 = vld [vmem:[#allocation5 + $0x84] ss:$16 sps:$4 sm:$0xff]   ;;  %v3097_v25 = vld [vmem:[#allocation5 + $0x80] ss:$16 sps:$4 sm:$0xff]  }
  0x30   :  { %222 = vmatprep.mubr.bf16.mxu0 %v3746_v0  ;;  %295 = vmatprep.mubr.bf16.mxu1 %v3746_v0  ;;  %v3102_v24 = vld [vmem:[#allocation5 + $0x284] ss:$16 sps:$4 sm:$0xff]   ;;  %v3100_v26 = vld [vmem:[#allocation5 + $0x280] ss:$16 sps:$4 sm:$0xff]  }
  0x31   :  { %1165 = vmatpush1.bf16.msra.mxu0 %v3079_v10  ;;  %1238 = vmatpush1.bf16.msra.mxu1 %v3082_v12  ;;  %v3105_v28 = vld [vmem:[#allocation5 + $0x64] ss:$16 sps:$4 sm:$0xff]   ;;  %v3103_v30 = vld [vmem:[#allocation5 + $0x60] ss:$16 sps:$4 sm:$0xff]  }
  0x32   :  { %1166 = vmatprep.subr.bf16.mxu0 %v3087_v15  ;;  %1239 = vmatprep.subr.bf16.mxu1 %v3090_v17  ;;  %v3108_v29 = vld [vmem:[#allocation5 + $0x264] ss:$16 sps:$4 sm:$0xff]   ;;  %v3106_v31 = vld [vmem:[#allocation5 + $0x260] ss:$16 sps:$4 sm:$0xff]   ;;  %v87_v15 = vlaneseq }
  0x33   :  { %v3111_v32 = vld [vmem:[#allocation5 + $0x44] ss:$16 sps:$4 sm:$0xff]   ;;  %v3109_v34 = vld [vmem:[#allocation5 + $0x40] ss:$16 sps:$4 sm:$0xff]  }
  0x34   :  { %v3114_v33 = vld [vmem:[#allocation5 + $0x244] ss:$16 sps:$4 sm:$0xff]   ;;  %v3112_v35 = vld [vmem:[#allocation5 + $0x240] ss:$16 sps:$4 sm:$0xff]  }
  0x35   :  { %1167 = vmatpush1.bf16.msra.mxu0 %v3085_v14  ;;  %1240 = vmatpush1.bf16.msra.mxu1 %v3088_v16  ;;  %v3117_v37 = vld [vmem:[#allocation5 + $0x24] ss:$16 sps:$4 sm:$0xff]   ;;  %v3115_v39 = vld [vmem:[#allocation5 + $0x20] ss:$16 sps:$4 sm:$0xff]   ;;  %v3180_v14 = vld [vmem:[#allocation5 + $0x2ec] ss:$16 sps:$4 sm:$0xff]  }
  0x36   :  { %1168 = vmatprep.subr.bf16.mxu0 %v3093_v19  ;;  %1241 = vmatprep.subr.bf16.mxu1 %v3096_v20  ;;  %v3120_v38 = vld [vmem:[#allocation5 + $0x224] ss:$16 sps:$4 sm:$0xff]   ;;  %v3118_v40 = vld [vmem:[#allocation5 + $0x220] ss:$16 sps:$4 sm:$0xff]   ;;  %v88_v16 = vshrl.u32 %v87_v15, 7 }
  0x37   :  { %2761 = vmatmul.mubr.msk.bf16.gmra.mxu0 %vm167_vm0, %v3076_v18  ;;  %2765 = vmatmul.mubr.msk.bf16.gmra.mxu1 %vm167_vm0, %v3076_v18  ;;  %v3123_v41 = vld [vmem:[#allocation5 + $0x4] ss:$16 sps:$4 sm:$0xff]   ;;  %v3121_v43 = vld [vmem:[#allocation5] ss:$16 sps:$4 sm:$0xff]  }
  0x38   :  { %232 = vmatprep.mubr.bf16.mxu0 %v3746_v0  ;;  %305 = vmatprep.mubr.bf16.mxu1 %v3746_v0  ;;  %v3126_v42 = vld [vmem:[#allocation5 + $0x204] ss:$16 sps:$4 sm:$0xff]   ;;  %v3124_v44 = vld [vmem:[#allocation5 + $0x200] ss:$16 sps:$4 sm:$0xff]   ;;  %v3834_v17 = vsub.s32 0, %v88_v16  ;;  %v3836_v18 = vsub.s32 2, %v88_v16 }
  0x39   :  { %1169 = vmatpush1.bf16.msra.mxu0 %v3091_v21  ;;  %1242 = vmatpush1.bf16.msra.mxu1 %v3094_v22  ;;  %v3129_v45 = vld [vmem:[#allocation5 + $0x1e4] ss:$16 sps:$4 sm:$0xff]   ;;  %v3127_v47 = vld [vmem:[#allocation5 + $0x1e0] ss:$16 sps:$4 sm:$0xff]   ;;  %v3841_v20 = vsub.s32 1, %v88_v16  ;;  %v3843_v21 = vsub.s32 3, %v88_v16 }
  0x3a   :  { %1170 = vmatprep.subr.bf16.mxu0 %v3099_v23  ;;  %1243 = vmatprep.subr.bf16.mxu1 %v3102_v24  ;;  %v3132_v46 = vld [vmem:[#allocation5 + $0x3e4] ss:$16 sps:$4 sm:$0xff]   ;;  %v3130_v48 = vld [vmem:[#allocation5 + $0x3e0] ss:$16 sps:$4 sm:$0xff]  }
  0x3b   :  { %v3135_v49 = vld [vmem:[#allocation5 + $0x1c4] ss:$16 sps:$4 sm:$0xff]   ;;  %v3133_v51 = vld [vmem:[#allocation5 + $0x1c0] ss:$16 sps:$4 sm:$0xff]  }
  0x3c   :  { %v3138_v50 = vld [vmem:[#allocation5 + $0x3c4] ss:$16 sps:$4 sm:$0xff]   ;;  %v3136_v52 = vld [vmem:[#allocation5 + $0x3c0] ss:$16 sps:$4 sm:$0xff]  }
  0x3d   :  { %1171 = vmatpush1.bf16.msra.mxu0 %v3097_v25  ;;  %1244 = vmatpush1.bf16.msra.mxu1 %v3100_v26  ;;  %v3141_v53 = vld [vmem:[#allocation5 + $0x1a4] ss:$16 sps:$4 sm:$0xff]   ;;  %v3139_v55 = vld [vmem:[#allocation5 + $0x1a0] ss:$16 sps:$4 sm:$0xff]  }
  0x3e   :  { %1172 = vmatprep.subr.bf16.mxu0 %v3105_v28  ;;  %1245 = vmatprep.subr.bf16.mxu1 %v3108_v29  ;;  %v3144_v54 = vld [vmem:[#allocation5 + $0x3a4] ss:$16 sps:$4 sm:$0xff]   ;;  %v3142_v56 = vld [vmem:[#allocation5 + $0x3a0] ss:$16 sps:$4 sm:$0xff]  }
  0x3f   :  { %2762 = vmatmul.mubr.msk.bf16.gmra.mxu0 %vm167_vm0, %v3077_v27  ;;  %2766 = vmatmul.mubr.msk.bf16.gmra.mxu1 %vm167_vm0, %v3077_v27  ;;  %v3147_v57 = vld [vmem:[#allocation5 + $0x184] ss:$16 sps:$4 sm:$0xff]   ;;  %v3145_v59 = vld [vmem:[#allocation5 + $0x180] ss:$16 sps:$4 sm:$0xff]  }
  0x40   :  { %242 = vmatprep.mubr.bf16.mxu0 %v3746_v0  ;;  %315 = vmatprep.mubr.bf16.mxu1 %v3746_v0  ;;  %v3150_v58 = vld [vmem:[#allocation5 + $0x384] ss:$16 sps:$4 sm:$0xff]   ;;  %v3148_v60 = vld [vmem:[#allocation5 + $0x380] ss:$16 sps:$4 sm:$0xff]  }
  0x41   :  { %1173 = vmatpush1.bf16.msra.mxu0 %v3103_v30  ;;  %1246 = vmatpush1.bf16.msra.mxu1 %v3106_v31  ;;  %v3153_v61 = vld [vmem:[#allocation5 + $0x164] ss:$16 sps:$4 sm:$0xff]   ;;  %v3151_v63 = vld [vmem:[#allocation5 + $0x160] ss:$16 sps:$4 sm:$0xff]  }
  0x42   :  { %1174 = vmatprep.subr.bf16.mxu0 %v3111_v32  ;;  %1247 = vmatprep.subr.bf16.mxu1 %v3114_v33  ;;  %v3156_v62 = vld [vmem:[#allocation5 + $0x364] ss:$16 sps:$4 sm:$0xff]   ;;  %v3154_v0 = vld [vmem:[#allocation5 + $0x360] ss:$16 sps:$4 sm:$0xff]  }
  0x43   :  { %v3159_v1 = vld [vmem:[#allocation5 + $0x144] ss:$16 sps:$4 sm:$0xff]   ;;  %v3157_v3 = vld [vmem:[#allocation5 + $0x140] ss:$16 sps:$4 sm:$0xff]  }
  0x44   :  { %v3162_v2 = vld [vmem:[#allocation5 + $0x344] ss:$16 sps:$4 sm:$0xff]   ;;  %v3160_v4 = vld [vmem:[#allocation5 + $0x340] ss:$16 sps:$4 sm:$0xff]  }
  0x45   :  { %1175 = vmatpush1.bf16.msra.mxu0 %v3109_v34  ;;  %1248 = vmatpush1.bf16.msra.mxu1 %v3112_v35  ;;  %v3165_v5 = vld [vmem:[#allocation5 + $0x124] ss:$16 sps:$4 sm:$0xff]   ;;  %v3163_v7 = vld [vmem:[#allocation5 + $0x120] ss:$16 sps:$4 sm:$0xff]  }
  0x46   :  { %1176 = vmatprep.subr.bf16.mxu0 %v3117_v37  ;;  %1249 = vmatprep.subr.bf16.mxu1 %v3120_v38  ;;  %v3168_v6 = vld [vmem:[#allocation5 + $0x324] ss:$16 sps:$4 sm:$0xff]   ;;  %v3166_v8 = vld [vmem:[#allocation5 + $0x320] ss:$16 sps:$4 sm:$0xff]  }
  0x47   :  { %2763 = vmatmul.mubr.msk.bf16.gmra.mxu0 %vm167_vm0, %v3078_v36  ;;  %2767 = vmatmul.mubr.msk.bf16.gmra.mxu1 %vm167_vm0, %v3078_v36  ;;  %v3171_v9 = vld [vmem:[#allocation5 + $0x104] ss:$16 sps:$4 sm:$0xff]   ;;  %v3169_v11 = vld [vmem:[#allocation5 + $0x100] ss:$16 sps:$4 sm:$0xff]  }
  0x48   :  { %v3174_v10 = vld [vmem:[#allocation5 + $0x304] ss:$16 sps:$4 sm:$0xff]   ;;  %v3172_v12 = vld [vmem:[#allocation5 + $0x300] ss:$16 sps:$4 sm:$0xff]  }
  0x49   :  { %1177 = vmatpush1.bf16.msra.mxu0 %v3115_v39  ;;  %1250 = vmatpush1.bf16.msra.mxu1 %v3118_v40  ;;  %v85_v19 = vld [vmem:[%s4123_s2] sm:$0xf] }
  0x4a   :  { %1178 = vmatprep.subr.bf16.mxu0 %v3123_v41  ;;  %1251 = vmatprep.subr.bf16.mxu1 %v3126_v42  ;;  %v3846_v22 = vrot.slane %v85_v19, %v3834_v17  ;;  %v3849_v23 = vrot.slane %v85_v19, %v3836_v18  ;;  %v3852_v24 = vrot.slane %v85_v19, %v3841_v20 }
  0x4b   :  { %v3855_v25 = vrot.slane %v85_v19, %v3843_v21 }
  0x4d   :  { %1179 = vmatpush1.bf16.msra.mxu0 %v3121_v43  ;;  %1252 = vmatpush1.bf16.msra.mxu1 %v3124_v44 }
  0x4e   :  { %1180 = vmatprep.subr.bf16.mxu0 %v3129_v45  ;;  %1253 = vmatprep.subr.bf16.mxu1 %v3132_v46 }
  0x51   :  { %1181 = vmatpush2.bf16.msra.mxu0 %v3127_v47  ;;  %1254 = vmatpush2.bf16.msra.mxu1 %v3130_v48 }
  0x52   :  { %1182 = vmatprep.subr.bf16.mxu0 %v3135_v49  ;;  %1255 = vmatprep.subr.bf16.mxu1 %v3138_v50 }
  0x55   :  { %1183 = vmatpush2.bf16.msra.mxu0 %v3133_v51  ;;  %1256 = vmatpush2.bf16.msra.mxu1 %v3136_v52 }
  0x56   :  { %1184 = vmatprep.subr.bf16.mxu0 %v3141_v53  ;;  %1257 = vmatprep.subr.bf16.mxu1 %v3144_v54 }
  0x59   :  { %1185 = vmatpush2.bf16.msra.mxu0 %v3139_v55  ;;  %1258 = vmatpush2.bf16.msra.mxu1 %v3142_v56 }
  0x5a   :  { %1186 = vmatprep.subr.bf16.mxu0 %v3147_v57  ;;  %1259 = vmatprep.subr.bf16.mxu1 %v3150_v58 }
  0x5d   :  { %1187 = vmatpush2.bf16.msra.mxu0 %v3145_v59  ;;  %1260 = vmatpush2.bf16.msra.mxu1 %v3148_v60 }
  0x5e   :  { %1188 = vmatprep.subr.bf16.mxu0 %v3153_v61  ;;  %1261 = vmatprep.subr.bf16.mxu1 %v3156_v62 }
  0x61   :  { %1189 = vmatpush2.bf16.msra.mxu0 %v3151_v63  ;;  %1262 = vmatpush2.bf16.msra.mxu1 %v3154_v0 }
  0x62   :  { %1190 = vmatprep.subr.bf16.mxu0 %v3159_v1  ;;  %1263 = vmatprep.subr.bf16.mxu1 %v3162_v2 }
  0x65   :  { %1191 = vmatpush2.bf16.msra.mxu0 %v3157_v3  ;;  %1264 = vmatpush2.bf16.msra.mxu1 %v3160_v4 }
  0x66   :  { %1192 = vmatprep.subr.bf16.mxu0 %v3165_v5  ;;  %1265 = vmatprep.subr.bf16.mxu1 %v3168_v6 }
  0x69   :  { %1193 = vmatpush2.bf16.msra.mxu0 %v3163_v7  ;;  %1266 = vmatpush2.bf16.msra.mxu1 %v3166_v8 }
  0x6a   :  { %1194 = vmatprep.subr.bf16.mxu0 %v3171_v9  ;;  %1267 = vmatprep.subr.bf16.mxu1 %v3174_v10 }
  0x6d   :  { %1195 = vmatpush2.bf16.msra.mxu0 %v3169_v11  ;;  %1268 = vmatpush2.bf16.msra.mxu1 %v3172_v12 }
  0x6e   :  { %1310 = vmatprep.subr.bf16.mxu0 %v3177_v13  ;;  %1383 = vmatprep.subr.bf16.mxu1 %v3180_v14 }
  0xef   :  { %v214_v26 = vpop.f32.mrf.mxu0  ;;  %v287_v27 = vpop.f32.mrf.mxu1 }
  0xf0   :  { %v215_v28 = vadd.f32 %v214_v26, %v3846_v22  ;;  %v288_v29 = vadd.f32 %v287_v27, %v3849_v23  ;;  %v3175_v27 = vld [vmem:[#allocation5 + $0xe8] ss:$16 sps:$4 sm:$0xff]  }
  0xf1   :  { %v216_v30 = vpop.f32.mrf.mxu0  ;;  %v289_v31 = vpop.f32.mrf.mxu1 }
  0xf2   :  { %3463 = vtanh.f32 %v215_v28  ;;  %v217_v32 = vadd.f32 %v216_v30, %v3852_v24  ;;  %v290_v33 = vadd.f32 %v289_v31, %v3855_v25 }
  0xf3   :  { %3465 = vtanh.f32 %v288_v29  ;;  %v218_v34 = vpop.f32.mrf.mxu0  ;;  %v291_v35 = vpop.f32.mrf.mxu1 }
  0xf4   :  { %3467 = vtanh.f32 %v217_v32  ;;  %v219_v36 = vadd.f32 %v218_v34, %v3846_v22  ;;  %v292_v37 = vadd.f32 %v291_v35, %v3849_v23  ;;  %v3178_v32 = vld [vmem:[#allocation5 + $0x2e8] ss:$16 sps:$4 sm:$0xff]   ;;  %v3183_v34 = vld [vmem:[#allocation5 + $0xcc] ss:$16 sps:$4 sm:$0xff]  }
  0xf5   :  { %3469 = vtanh.f32 %v290_v33  ;;  %v220_v38 = vpop.f32.mrf.mxu0  ;;  %v293_v39 = vpop.f32.mrf.mxu1 }
  0xf6   :  { %3471 = vtanh.f32 %v219_v36  ;;  %v221_v40 = vadd.f32 %v220_v38, %v3852_v24  ;;  %v294_v41 = vadd.f32 %v293_v39, %v3855_v25  ;;  %v3186_v39 = vld [vmem:[#allocation5 + $0x2cc] ss:$16 sps:$4 sm:$0xff]  }
  0xf7   :  { %3473 = vtanh.f32 %v292_v37  ;;  %v224_v42 = vpop.f32.mrf.mxu0  ;;  %v297_v43 = vpop.f32.mrf.mxu1 }
  0xf8   :  { %3475 = vtanh.f32 %v221_v40  ;;  %v225_v44 = vadd.f32 %v224_v42, %v3846_v22  ;;  %v298_v45 = vadd.f32 %v297_v43, %v3849_v23 }
  0xf9   :  { %3477 = vtanh.f32 %v294_v41  ;;  %v226_v46 = vpop.f32.mrf.mxu0  ;;  %v299_v47 = vpop.f32.mrf.mxu1 }
  0xfa   :  { %3479 = vtanh.f32 %v225_v44  ;;  %v227_v48 = vadd.f32 %v226_v46, %v3852_v24  ;;  %v300_v49 = vadd.f32 %v299_v47, %v3855_v25  ;;  %v3181_v46 = vld [vmem:[#allocation5 + $0xc8] ss:$16 sps:$4 sm:$0xff]  }
  0xfb   :  { %3481 = vtanh.f32 %v298_v45  ;;  %v228_v50 = vpop.f32.mrf.mxu0  ;;  %v301_v51 = vpop.f32.mrf.mxu1 }
  0xfc   :  { %3483 = vtanh.f32 %v227_v48  ;;  %v229_v52 = vadd.f32 %v228_v50, %v3846_v22  ;;  %v302_v53 = vadd.f32 %v301_v51, %v3849_v23  ;;  %v3184_v50 = vld [vmem:[#allocation5 + $0x2c8] ss:$16 sps:$4 sm:$0xff]   ;;  %v3189_v51 = vld [vmem:[#allocation5 + $0xac] ss:$16 sps:$4 sm:$0xff]  }
  0xfd   :  { %3485 = vtanh.f32 %v300_v49  ;;  %v230_v54 = vpop.f32.mrf.mxu0  ;;  %v303_v55 = vpop.f32.mrf.mxu1 }
  0xfe   :  { %3487 = vtanh.f32 %v229_v52  ;;  %v231_v56 = vadd.f32 %v230_v54, %v3852_v24  ;;  %v304_v57 = vadd.f32 %v303_v55, %v3855_v25  ;;  %v3192_v55 = vld [vmem:[#allocation5 + $0x2ac] ss:$16 sps:$4 sm:$0xff]  }
  0xff   :  { %v3464_v58 = vpop.eup %3463  ;;  %3489 = vtanh.f32 %v302_v53  ;;  %v234_v59 = vpop.f32.mrf.mxu0 }
 0x100   :  { %v307_v60 = vpop.f32.mrf.mxu1  ;;  %v3466_v61 = vpop.eup %3465  ;;  %3491 = vtanh.f32 %v231_v56  ;;  %v235_v62 = vadd.f32 %v234_v59, %v3846_v22 }
 0x101   :  { %v308_v63 = vadd.f32 %v307_v60, %v3849_v23  ;;  %v3468_v0 = vpop.eup %3467  ;;  %3493 = vtanh.f32 %v304_v57  ;;  %v236_v1 = vpop.f32.mrf.mxu0 }
 0x102   :  { %v309_v2 = vpop.f32.mrf.mxu1  ;;  %v3470_v3 = vpop.eup %3469  ;;  %3495 = vtanh.f32 %v235_v62  ;;  %v237_v4 = vadd.f32 %v236_v1, %v3852_v24 }
 0x103   :  { %v310_v5 = vadd.f32 %v309_v2, %v3855_v25  ;;  %v3472_v6 = vpop.eup %3471  ;;  %3497 = vtanh.f32 %v308_v63  ;;  %v238_v7 = vpop.f32.mrf.mxu0  ;;  %v3190_v2 = vld [vmem:[#allocation5 + $0x2a8] ss:$16 sps:$4 sm:$0xff]  }
 0x104   :  { %v311_v8 = vpop.f32.mrf.mxu1  ;;  %v3474_v9 = vpop.eup %3473  ;;  %3499 = vtanh.f32 %v237_v4  ;;  %v239_v10 = vadd.f32 %v238_v7, %v3846_v22  ;;  %v3885_v33 = vpack.c.bf16 %v3472_v6, %v3464_v58  ;;  %v3193_v6 = vld [vmem:[#allocation5 + $0x88] ss:$16 sps:$4 sm:$0xff]  }
 0x105   :  { %v312_v11 = vadd.f32 %v311_v8, %v3849_v23  ;;  %v3476_v12 = vpop.eup %3475  ;;  %3501 = vtanh.f32 %v310_v5  ;;  %v240_v13 = vpop.f32.mrf.mxu0  ;;  %v3890_v38 = vpack.c.bf16 %v3474_v9, %v3466_v61  ;;  %v3196_v8 = vld [vmem:[#allocation5 + $0x288] ss:$16 sps:$4 sm:$0xff]   ;;  %v3201_v9 = vld [vmem:[#allocation5 + $0x6c] ss:$16 sps:$4 sm:$0xff]  }
 0x106   :  { %v313_v14 = vpop.f32.mrf.mxu1  ;;  %v3478_v15 = vpop.eup %3477  ;;  %3503 = vtanh.f32 %v239_v10  ;;  %v241_v16 = vadd.f32 %v240_v13, %v3852_v24  ;;  %v3881_v26 = vpack.c.bf16 %v3476_v12, %v3468_v0 }
 0x107   :  { %v314_v19 = vadd.f32 %v313_v14, %v3855_v25  ;;  %v3480_v28 = vpop.eup %3479  ;;  %3505 = vtanh.f32 %v312_v11  ;;  %v244_v29 = vpop.f32.mrf.mxu0  ;;  %v3883_v31 = vpack.c.bf16 %v3478_v15, %v3470_v3  ;;  %v3195_v3 = vld [vmem:[#allocation5 + $0x8c] ss:$16 sps:$4 sm:$0xff]  }
 0x108   :  { %v317_v30 = vpop.f32.mrf.mxu1  ;;  %v3482_v35 = vpop.eup %3481  ;;  %3507 = vtanh.f32 %v241_v16  ;;  %v245_v36 = vadd.f32 %v244_v29, %v3846_v22  ;;  %1196 = vmatprep.mubr.bf16.mxu0 %v3881_v26  ;;  %v3204_v11 = vld [vmem:[#allocation5 + $0x26c] ss:$16 sps:$4 sm:$0xff]   ;;  %v3199_v16 = vld [vmem:[#allocation5 + $0x68] ss:$16 sps:$4 sm:$0xff]  }
 0x109   :  { %v318_v37 = vadd.f32 %v317_v30, %v3849_v23  ;;  %v3484_v40 = vpop.eup %3483  ;;  %3509 = vtanh.f32 %v314_v19  ;;  %1269 = vmatprep.mubr.bf16.mxu1 %v3883_v31  ;;  %v246_v41 = vpop.f32.mrf.mxu0  ;;  %1197 = vmatmul.mubr.bf16.vlgmr.msra.gmra.mxu0 %v3885_v33  ;;  %v3202_v29 = vld [vmem:[#allocation5 + $0x268] ss:$16 sps:$4 sm:$0xff]   ;;  %v3207_v30 = vld [vmem:[#allocation5 + $0x4c] ss:$16 sps:$4 sm:$0xff]  }
 0x10a   :  { %v319_v42 = vpop.f32.mrf.mxu1  ;;  %v3486_v43 = vpop.eup %3485  ;;  %3511 = vtanh.f32 %v245_v36  ;;  %v247_v44 = vadd.f32 %v246_v41, %v3852_v24  ;;  %1270 = vmatmul.mubr.bf16.vlgmr.msra.gmra.mxu1 %v3890_v38  ;;  %1311 = vmatpush1.bf16.msra.mxu0 %v3175_v27  ;;  %v3213_v41 = vld [vmem:[#allocation5 + $0x2c] ss:$16 sps:$4 sm:$0xff]  }
 0x10b   :  { %v320_v45 = vadd.f32 %v319_v42, %v3855_v25  ;;  %v3488_v47 = vpop.eup %3487  ;;  %3513 = vtanh.f32 %v318_v37  ;;  %1384 = vmatpush1.bf16.msra.mxu1 %v3178_v32  ;;  %v248_v48 = vpop.f32.mrf.mxu0  ;;  %1312 = vmatprep.subr.bf16.mxu0 %v3183_v34  ;;  %v3210_v34 = vld [vmem:[#allocation5 + $0x24c] ss:$16 sps:$4 sm:$0xff]   ;;  %v3205_v37 = vld [vmem:[#allocation5 + $0x48] ss:$16 sps:$4 sm:$0xff]  }
 0x10c   :  { %v321_v49 = vpop.f32.mrf.mxu1  ;;  %v3490_v52 = vpop.eup %3489  ;;  %3515 = vtanh.f32 %v247_v44  ;;  %v249_v53 = vadd.f32 %v248_v48, %v3846_v22  ;;  %1385 = vmatprep.subr.bf16.mxu1 %v3186_v39  ;;  %v3899_v59 = vpack.c.bf16 %v3488_v47, %v3480_v28  ;;  %v3211_v48 = vld [vmem:[#allocation5 + $0x28] ss:$16 sps:$4 sm:$0xff]  }
 0x10d   :  { %v322_v54 = vadd.f32 %v321_v49, %v3849_v23  ;;  %v3492_v56 = vpop.eup %3491  ;;  %3517 = vtanh.f32 %v320_v45  ;;  %v250_v57 = vpop.f32.mrf.mxu0  ;;  %v3901_v60 = vpack.c.bf16 %v3490_v52, %v3482_v35  ;;  %v3187_v23 = vld [vmem:[#allocation5 + $0xa8] ss:$16 sps:$4 sm:$0xff]   ;;  %v3219_v52 = vld [vmem:[#allocation5 + $0xc] ss:$16 sps:$4 sm:$0xff]  }
 0x10e   :  { %v323_v58 = vpop.f32.mrf.mxu1  ;;  %v3494_v61 = vpop.eup %3493  ;;  %3519 = vtanh.f32 %v249_v53  ;;  %v251_v62 = vadd.f32 %v250_v57, %v3852_v24  ;;  %1313 = vmatpush1.bf16.msra.mxu0 %v3181_v46  ;;  %v3905_v22 = vpack.c.bf16 %v3492_v56, %v3484_v40  ;;  %v3198_v24 = vld [vmem:[#allocation5 + $0x28c] ss:$16 sps:$4 sm:$0xff]   ;;  %v3208_v40 = vld [vmem:[#allocation5 + $0x248] ss:$16 sps:$4 sm:$0xff]  }
 0x10f   :  { %v324_v63 = vadd.f32 %v323_v58, %v3855_v25  ;;  %v3496_v0 = vpop.eup %3495  ;;  %3521 = vtanh.f32 %v322_v54  ;;  %1386 = vmatpush1.bf16.msra.mxu1 %v3184_v50  ;;  %v3907_v1 = vpack.c.bf16 %v3494_v61, %v3486_v43  ;;  %1314 = vmatprep.subr.bf16.mxu0 %v3189_v51  ;;  %v3216_v43 = vld [vmem:[#allocation5 + $0x22c] ss:$16 sps:$4 sm:$0xff]   ;;  %v3214_v51 = vld [vmem:[#allocation5 + $0x228] ss:$16 sps:$4 sm:$0xff]  }
 0x110   :  { %v3498_v4 = vpop.eup %3497  ;;  %3523 = vtanh.f32 %v251_v62  ;;  %1206 = vmatprep.mubr.bf16.mxu0 %v3905_v22  ;;  %1387 = vmatprep.subr.bf16.mxu1 %v3192_v55  ;;  %v3222_v53 = vld [vmem:[#allocation5 + $0x20c] ss:$16 sps:$4 sm:$0xff]   ;;  %v3217_v54 = vld [vmem:[#allocation5 + $0x8] ss:$16 sps:$4 sm:$0xff]  }
 0x111   :  { %v3500_v5 = vpop.eup %3499  ;;  %3525 = vtanh.f32 %v324_v63  ;;  %1279 = vmatprep.mubr.bf16.mxu1 %v3907_v1  ;;  %1207 = vmatmul.mubr.bf16.gmra.mxu0 %v3899_v59  ;;  %v3220_v55 = vld [vmem:[#allocation5 + $0x208] ss:$16 sps:$4 sm:$0xff]   ;;  %v3225_v56 = vld [vmem:[#allocation5 + $0x1ec] ss:$16 sps:$4 sm:$0xff]  }
 0x112   :  { %v3502_v25 = vpop.eup %3501  ;;  %1280 = vmatmul.mubr.bf16.gmra.mxu1 %v3901_v60  ;;  %1315 = vmatpush1.bf16.msra.mxu0 %v3187_v23  ;;  %v3228_v57 = vld [vmem:[#allocation5 + $0x3ec] ss:$16 sps:$4 sm:$0xff]   ;;  %v3223_v58 = vld [vmem:[#allocation5 + $0x1e8] ss:$16 sps:$4 sm:$0xff]  }
 0x113   :  { %v3504_v7 = vpop.eup %3503  ;;  %1388 = vmatpush1.bf16.msra.mxu1 %v3190_v2  ;;  %1316 = vmatprep.subr.bf16.mxu0 %v3195_v3  ;;  %v3226_v61 = vld [vmem:[#allocation5 + $0x3e8] ss:$16 sps:$4 sm:$0xff]   ;;  %v3231_v62 = vld [vmem:[#allocation5 + $0x1cc] ss:$16 sps:$4 sm:$0xff]  }
 0x114   :  { %v3506_v10 = vpop.eup %3505  ;;  %1389 = vmatprep.subr.bf16.mxu1 %v3198_v24  ;;  %v3913_v13 = vpack.c.bf16 %v3504_v7, %v3496_v0  ;;  %v3234_v63 = vld [vmem:[#allocation5 + $0x3cc] ss:$16 sps:$4 sm:$0xff]   ;;  %v3229_v23 = vld [vmem:[#allocation5 + $0x1c8] ss:$16 sps:$4 sm:$0xff]  }
 0x115   :  { %v3508_v12 = vpop.eup %3507  ;;  %v3917_v19 = vpack.c.bf16 %v3506_v10, %v3498_v4  ;;  %v3237_v0 = vld [vmem:[#allocation5 + $0x1ac] ss:$16 sps:$4 sm:$0xff]   ;;  %v3238_v3 = vld [vmem:[#allocation5 + $0x3a8] ss:$16 sps:$4 sm:$0xff]  }
 0x116   :  { %v3510_v14 = vpop.eup %3509  ;;  %1317 = vmatpush1.bf16.msra.mxu0 %v3193_v6  ;;  %v3915_v15 = vpack.c.bf16 %v3508_v12, %v3500_v5  ;;  %v3240_v2 = vld [vmem:[#allocation5 + $0x3ac] ss:$16 sps:$4 sm:$0xff]   ;;  %v3241_v5 = vld [vmem:[#allocation5 + $0x188] ss:$16 sps:$4 sm:$0xff]  }
 0x117   :  { %v3512_v27 = vpop.eup %3511  ;;  %1390 = vmatpush1.bf16.msra.mxu1 %v3196_v8  ;;  %v3919_v28 = vpack.c.bf16 %v3510_v14, %v3502_v25  ;;  %1318 = vmatprep.subr.bf16.mxu0 %v3201_v9  ;;  %v3243_v4 = vld [vmem:[#allocation5 + $0x18c] ss:$16 sps:$4 sm:$0xff]   ;;  %v3244_v25 = vld [vmem:[#allocation5 + $0x388] ss:$16 sps:$4 sm:$0xff]  }
 0x118   :  { %v3514_v32 = vpop.eup %3513  ;;  %1216 = vmatprep.mubr.bf16.mxu0 %v3915_v15  ;;  %1391 = vmatprep.subr.bf16.mxu1 %v3204_v11  ;;  %v3246_v24 = vld [vmem:[#allocation5 + $0x38c] ss:$16 sps:$4 sm:$0xff]   ;;  %v3247_v8 = vld [vmem:[#allocation5 + $0x168] ss:$16 sps:$4 sm:$0xff]  }
 0x119   :  { %v3516_v35 = vpop.eup %3515  ;;  %1289 = vmatprep.mubr.bf16.mxu1 %v3919_v28  ;;  %1217 = vmatmul.mubr.bf16.gmra.mxu0 %v3913_v13  ;;  %v3249_v6 = vld [vmem:[#allocation5 + $0x16c] ss:$16 sps:$4 sm:$0xff]   ;;  %v3250_v9 = vld [vmem:[#allocation5 + $0x368] ss:$16 sps:$4 sm:$0xff]  }
 0x11a   :  { %v3518_v36 = vpop.eup %3517  ;;  %1290 = vmatmul.mubr.bf16.gmra.mxu1 %v3917_v19  ;;  %1319 = vmatpush1.bf16.msra.mxu0 %v3199_v16  ;;  %v3252_v7 = vld [vmem:[#allocation5 + $0x36c] ss:$16 sps:$4 sm:$0xff]   ;;  %v3253_v12 = vld [vmem:[#allocation5 + $0x148] ss:$16 sps:$4 sm:$0xff]  }
 0x11b   :  { %v3520_v39 = vpop.eup %3519  ;;  %1392 = vmatpush1.bf16.msra.mxu1 %v3202_v29  ;;  %1320 = vmatprep.subr.bf16.mxu0 %v3207_v30  ;;  %v3255_v10 = vld [vmem:[#allocation5 + $0x14c] ss:$16 sps:$4 sm:$0xff]   ;;  %v3256_v14 = vld [vmem:[#allocation5 + $0x348] ss:$16 sps:$4 sm:$0xff]  }
 0x11c   :  { %v3522_v42 = vpop.eup %3521  ;;  %1393 = vmatprep.subr.bf16.mxu1 %v3210_v34  ;;  %v3925_v45 = vpack.c.bf16 %v3520_v39, %v3512_v27  ;;  %v3258_v11 = vld [vmem:[#allocation5 + $0x34c] ss:$16 sps:$4 sm:$0xff]   ;;  %v3259_v29 = vld [vmem:[#allocation5 + $0x128] ss:$16 sps:$4 sm:$0xff]   ;;  %v3271_v39 = vld [vmem:[#allocation7 + $0xe0] ss:$16 sps:$4 sm:$0xff]  }
 0x11d   :  { %v3524_v44 = vpop.eup %3523  ;;  %v3929_v49 = vpack.c.bf16 %v3522_v42, %v3514_v32  ;;  %v3261_v16 = vld [vmem:[#allocation5 + $0x12c] ss:$16 sps:$4 sm:$0xff]   ;;  %v3262_v30 = vld [vmem:[#allocation5 + $0x328] ss:$16 sps:$4 sm:$0xff]   ;;  %v3279_v42 = vld [vmem:[#allocation7 + $0xa4] ss:$16 sps:$4 sm:$0xff]  }
 0x11e   :  { %v3526_v46 = vpop.eup %3525  ;;  %1321 = vmatpush1.bf16.msra.mxu0 %v3205_v37  ;;  %v3927_v47 = vpack.c.bf16 %v3524_v44, %v3516_v35  ;;  %v3264_v27 = vld [vmem:[#allocation5 + $0x32c] ss:$16 sps:$4 sm:$0xff]   ;;  %v3265_v35 = vld [vmem:[#allocation5 + $0x108] ss:$16 sps:$4 sm:$0xff]   ;;  %v3273_v37 = vld [vmem:[#allocation7 + $0xe4] ss:$16 sps:$4 sm:$0xff]  }
 0x11f   :  { %1394 = vmatpush1.bf16.msra.mxu1 %v3208_v40  ;;  %v3931_v50 = vpack.c.bf16 %v3526_v46, %v3518_v36  ;;  %1322 = vmatprep.subr.bf16.mxu0 %v3213_v41  ;;  %v3267_v32 = vld [vmem:[#allocation5 + $0x10c] ss:$16 sps:$4 sm:$0xff]   ;;  %v3268_v36 = vld [vmem:[#allocation5 + $0x308] ss:$16 sps:$4 sm:$0xff]   ;;  %v3276_v40 = vld [vmem:[#allocation7 + $0xc4] ss:$16 sps:$4 sm:$0xff]  }
 0x120   :  { %1226 = vmatprep.mubr.bf16.mxu0 %v3927_v47  ;;  %1395 = vmatprep.subr.bf16.mxu1 %v3216_v43  ;;  %v3270_v34 = vld [vmem:[#allocation5 + $0x30c] ss:$16 sps:$4 sm:$0xff]   ;;  %v3274_v41 = vld [vmem:[#allocation7 + $0xc0] ss:$16 sps:$4 sm:$0xff]   ;;  %v3282_v44 = vld [vmem:[#allocation7 + $0x84] ss:$16 sps:$4 sm:$0xff]  }
 0x121   :  { %1299 = vmatprep.mubr.bf16.mxu1 %v3931_v50  ;;  %1227 = vmatmul.mubr.bf16.gmra.mxu0 %v3925_v45  ;;  %v3277_v43 = vld [vmem:[#allocation7 + $0xa0] ss:$16 sps:$4 sm:$0xff]   ;;  %v3321_v46 = vld [vmem:[#allocation7 + $0x2e4] ss:$16 sps:$4 sm:$0xff]  }
 0x122   :  { %1300 = vmatmul.mubr.bf16.gmra.mxu1 %v3929_v49  ;;  %1323 = vmatpush1.bf16.msra.mxu0 %v3211_v48  ;;  %v3295_v48 = vld [vmem:[#allocation7 + $0x1e0] ss:$16 sps:$4 sm:$0xff]  }
 0x123   :  { %1396 = vmatpush1.bf16.msra.mxu1 %v3214_v51  ;;  %1342 = vmatprep.mubr.bf16.mxu0 %v3881_v26  ;;  %v3232_v26 = vld [vmem:[#allocation5 + $0x3c8] ss:$16 sps:$4 sm:$0xff]   ;;  %v3300_v51 = vld [vmem:[#allocation7 + $0x1c4] ss:$16 sps:$4 sm:$0xff]  }
 0x124   :  { %1415 = vmatprep.mubr.bf16.mxu1 %v3883_v31  ;;  %1324 = vmatprep.subr.bf16.mxu0 %v3219_v52  ;;  %v3235_v31 = vld [vmem:[#allocation5 + $0x1a8] ss:$16 sps:$4 sm:$0xff]   ;;  %v3325_v52 = vld [vmem:[#allocation7 + $0x2c0] ss:$16 sps:$4 sm:$0xff]  }
 0x125   :  { %1397 = vmatprep.subr.bf16.mxu1 %v3222_v53  ;;  %v3333_v53 = vld [vmem:[#allocation7 + $0x2a4] ss:$16 sps:$4 sm:$0xff]  }
 0x126   :  { %1325 = vmatpush1.bf16.msra.mxu0 %v3217_v54  ;;  %v3331_v54 = vld [vmem:[#allocation7 + $0x2a0] ss:$16 sps:$4 sm:$0xff]  }
 0x127   :  { %1398 = vmatpush1.bf16.msra.mxu1 %v3220_v55  ;;  %1326 = vmatprep.subr.bf16.mxu0 %v3225_v56  ;;  %v3337_v55 = vld [vmem:[#allocation7 + $0x280] ss:$16 sps:$4 sm:$0xff]   ;;  %v3339_v56 = vld [vmem:[#allocation7 + $0x284] ss:$16 sps:$4 sm:$0xff]  }
 0x128   :  { %1399 = vmatprep.subr.bf16.mxu1 %v3228_v57  ;;  %v3301_v57 = vld [vmem:[#allocation7 + $0x1a0] ss:$16 sps:$4 sm:$0xff]  }
 0x12a   :  { %1327 = vmatpush2.bf16.msra.mxu0 %v3223_v58  ;;  %v3306_v58 = vld [vmem:[#allocation7 + $0x184] ss:$16 sps:$4 sm:$0xff]  }
 0x12b   :  { %1400 = vmatpush2.bf16.msra.mxu1 %v3226_v61  ;;  %1328 = vmatprep.subr.bf16.mxu0 %v3231_v62  ;;  %v3343_v61 = vld [vmem:[#allocation7 + $0x260] ss:$16 sps:$4 sm:$0xff]   ;;  %v3345_v62 = vld [vmem:[#allocation7 + $0x264] ss:$16 sps:$4 sm:$0xff]  }
 0x12c   :  { %1401 = vmatprep.subr.bf16.mxu1 %v3234_v63  ;;  %v3304_v63 = vld [vmem:[#allocation7 + $0x180] ss:$16 sps:$4 sm:$0xff]  }
 0x12e   :  { %1329 = vmatpush2.bf16.msra.mxu0 %v3229_v23  ;;  %v3309_v23 = vld [vmem:[#allocation7 + $0x164] ss:$16 sps:$4 sm:$0xff]  }
 0x12f   :  { %1402 = vmatpush2.bf16.msra.mxu1 %v3232_v26  ;;  %1330 = vmatprep.subr.bf16.mxu0 %v3237_v0  ;;  %v3349_v26 = vld [vmem:[#allocation7 + $0x240] ss:$16 sps:$4 sm:$0xff]   ;;  %v3351_v0 = vld [vmem:[#allocation7 + $0x244] ss:$16 sps:$4 sm:$0xff]  }
 0x130   :  { %1403 = vmatprep.subr.bf16.mxu1 %v3240_v2  ;;  %v3307_v2 = vld [vmem:[#allocation7 + $0x160] ss:$16 sps:$4 sm:$0xff]  }
 0x132   :  { %1331 = vmatpush2.bf16.msra.mxu0 %v3235_v31  ;;  %v3312_v31 = vld [vmem:[#allocation7 + $0x144] ss:$16 sps:$4 sm:$0xff]  }
 0x133   :  { %1404 = vmatpush2.bf16.msra.mxu1 %v3238_v3  ;;  %1332 = vmatprep.subr.bf16.mxu0 %v3243_v4  ;;  %v3355_v3 = vld [vmem:[#allocation7 + $0x220] ss:$16 sps:$4 sm:$0xff]   ;;  %v3357_v4 = vld [vmem:[#allocation7 + $0x224] ss:$16 sps:$4 sm:$0xff]  }
 0x134   :  { %1405 = vmatprep.subr.bf16.mxu1 %v3246_v24  ;;  %v3310_v24 = vld [vmem:[#allocation7 + $0x140] ss:$16 sps:$4 sm:$0xff]  }
 0x136   :  { %1333 = vmatpush2.bf16.msra.mxu0 %v3241_v5  ;;  %v3315_v5 = vld [vmem:[#allocation7 + $0x124] ss:$16 sps:$4 sm:$0xff]  }
 0x137   :  { %1406 = vmatpush2.bf16.msra.mxu1 %v3244_v25  ;;  %1334 = vmatprep.subr.bf16.mxu0 %v3249_v6  ;;  %v3361_v25 = vld [vmem:[#allocation7 + $0x200] ss:$16 sps:$4 sm:$0xff]   ;;  %v3363_v6 = vld [vmem:[#allocation7 + $0x204] ss:$16 sps:$4 sm:$0xff]  }
 0x138   :  { %1407 = vmatprep.subr.bf16.mxu1 %v3252_v7  ;;  %v3313_v7 = vld [vmem:[#allocation7 + $0x120] ss:$16 sps:$4 sm:$0xff]  }
 0x13a   :  { %1335 = vmatpush2.bf16.msra.mxu0 %v3247_v8  ;;  %v3318_v8 = vld [vmem:[#allocation7 + $0x104] ss:$16 sps:$4 sm:$0xff]  }
 0x13b   :  { %1408 = vmatpush2.bf16.msra.mxu1 %v3250_v9  ;;  %1336 = vmatprep.subr.bf16.mxu0 %v3255_v10  ;;  %v3367_v9 = vld [vmem:[#allocation7 + $0x3e0] ss:$16 sps:$4 sm:$0xff]   ;;  %v3369_v10 = vld [vmem:[#allocation7 + $0x3e4] ss:$16 sps:$4 sm:$0xff]  }
 0x13c   :  { %1409 = vmatprep.subr.bf16.mxu1 %v3258_v11  ;;  %v3316_v11 = vld [vmem:[#allocation7 + $0x100] ss:$16 sps:$4 sm:$0xff]  }
 0x13e   :  { %1337 = vmatpush2.bf16.msra.mxu0 %v3253_v12  ;;  %v3324_v12 = vld [vmem:[#allocation7 + $0xec] ss:$16 sps:$4 sm:$0xff]  }
 0x13f   :  { %1410 = vmatpush2.bf16.msra.mxu1 %v3256_v14  ;;  %1338 = vmatprep.subr.bf16.mxu0 %v3261_v16  ;;  %v3373_v14 = vld [vmem:[#allocation7 + $0x3c0] ss:$16 sps:$4 sm:$0xff]   ;;  %v3375_v16 = vld [vmem:[#allocation7 + $0x3c4] ss:$16 sps:$4 sm:$0xff]  }
 0x140   :  { %1411 = vmatprep.subr.bf16.mxu1 %v3264_v27  ;;  %v3381_v27 = vld [vmem:[#allocation7 + $0x3a4] ss:$16 sps:$4 sm:$0xff]  }
 0x142   :  { %1339 = vmatpush2.bf16.msra.mxu0 %v3259_v29  ;;  %v3379_v29 = vld [vmem:[#allocation7 + $0x3a0] ss:$16 sps:$4 sm:$0xff]  }
 0x143   :  { %1412 = vmatpush2.bf16.msra.mxu1 %v3262_v30  ;;  %1340 = vmatprep.subr.bf16.mxu0 %v3267_v32  ;;  %v3387_v30 = vld [vmem:[#allocation7 + $0x384] ss:$16 sps:$4 sm:$0xff]   ;;  %v3385_v32 = vld [vmem:[#allocation7 + $0x380] ss:$16 sps:$4 sm:$0xff]  }
 0x144   :  { %1413 = vmatprep.subr.bf16.mxu1 %v3270_v34  ;;  %v3393_v34 = vld [vmem:[#allocation7 + $0x364] ss:$16 sps:$4 sm:$0xff]  }
 0x146   :  { %1341 = vmatpush2.bf16.msra.mxu0 %v3265_v35  ;;  %v3391_v35 = vld [vmem:[#allocation7 + $0x360] ss:$16 sps:$4 sm:$0xff]  }
 0x147   :  { %1414 = vmatpush2.bf16.msra.mxu1 %v3268_v36  ;;  %2294 = vmatprep.subr.bf16.mxu0 %v3273_v37  ;;  %v3399_v36 = vld [vmem:[#allocation7 + $0x344] ss:$16 sps:$4 sm:$0xff]   ;;  %v3397_v37 = vld [vmem:[#allocation7 + $0x340] ss:$16 sps:$4 sm:$0xff]  }
 0x148   :  { %2367 = vmatprep.subr.bf16.mxu1 %v3321_v46 }
 0x149   :  { %1343 = vmatmul.mubr.bf16.vlgmr.msra.gmra.mxu0 %v3885_v33  ;;  %v3280_v33 = vld [vmem:[#allocation7 + $0x80] ss:$16 sps:$4 sm:$0xff]  }
 0x14a   :  { %1416 = vmatmul.mubr.bf16.vlgmr.msra.gmra.mxu1 %v3890_v38  ;;  %1352 = vmatprep.mubr.bf16.mxu0 %v3905_v22  ;;  %v3285_v38 = vld [vmem:[#allocation7 + $0x64] ss:$16 sps:$4 sm:$0xff]   ;;  %v3283_v22 = vld [vmem:[#allocation7 + $0x60] ss:$16 sps:$4 sm:$0xff]  }
 0x14b   :  { %1425 = vmatprep.mubr.bf16.mxu1 %v3907_v1  ;;  %2295 = vmatpush1.bf16.msra.mxu0 %v3271_v39  ;;  %v3288_v1 = vld [vmem:[#allocation7 + $0x44] ss:$16 sps:$4 sm:$0xff]  }
 0x14c   :  { %2296 = vmatprep.subr.bf16.mxu0 %v3276_v40  ;;  %v3405_v39 = vld [vmem:[#allocation7 + $0x324] ss:$16 sps:$4 sm:$0xff]   ;;  %v3403_v40 = vld [vmem:[#allocation7 + $0x320] ss:$16 sps:$4 sm:$0xff]  }
 0x14f   :  { %2297 = vmatpush1.bf16.msra.mxu0 %v3274_v41  ;;  %v3411_v41 = vld [vmem:[#allocation7 + $0x304] ss:$16 sps:$4 sm:$0xff]  }
 0x150   :  { %2298 = vmatprep.subr.bf16.mxu0 %v3279_v42  ;;  %v3409_v42 = vld [vmem:[#allocation7 + $0x300] ss:$16 sps:$4 sm:$0xff]  }
 0x151   :  { %1353 = vmatmul.mubr.bf16.gmra.mxu0 %v3899_v59  ;;  %v3286_v59 = vld [vmem:[#allocation7 + $0x40] ss:$16 sps:$4 sm:$0xff]  }
 0x152   :  { %1426 = vmatmul.mubr.bf16.gmra.mxu1 %v3901_v60  ;;  %1362 = vmatprep.mubr.bf16.mxu0 %v3915_v15  ;;  %v3291_v60 = vld [vmem:[#allocation7 + $0x24] ss:$16 sps:$4 sm:$0xff]   ;;  %v3289_v15 = vld [vmem:[#allocation7 + $0x20] ss:$16 sps:$4 sm:$0xff]  }
 0x153   :  { %1435 = vmatprep.mubr.bf16.mxu1 %v3919_v28  ;;  %2299 = vmatpush1.bf16.msra.mxu0 %v3277_v43  ;;  %v3294_v28 = vld [vmem:[#allocation7 + $0x4] ss:$16 sps:$4 sm:$0xff]   ;;  %v3417_v43 = vld [vmem:[#allocation7 + $0x2ec] ss:$16 sps:$4 sm:$0xff]  }
 0x154   :  { %2300 = vmatprep.subr.bf16.mxu0 %v3282_v44  ;;  %v3956_v44 = vld [vmem:[%s4125_s4] sm:$0xf] }
 0x157   :  { %2301 = vmatpush1.bf16.msra.mxu0 %v3280_v33  ;;  %v3960_v33 = vrot.slane %v3956_v44, %v3841_v20 }
 0x158   :  { %2302 = vmatprep.subr.bf16.mxu0 %v3285_v38  ;;  %v3964_v38 = vrot.slane %v3956_v44, %v3834_v17 }
 0x159   :  { %1363 = vmatmul.mubr.bf16.gmra.mxu0 %v3913_v13  ;;  %v3292_v13 = vld [vmem:[#allocation7] ss:$16 sps:$4 sm:$0xff]  }
 0x15a   :  { %1436 = vmatmul.mubr.bf16.gmra.mxu1 %v3917_v19  ;;  %1372 = vmatprep.mubr.bf16.mxu0 %v3927_v47  ;;  %v3297_v19 = vld [vmem:[#allocation7 + $0x1e4] ss:$16 sps:$4 sm:$0xff]   ;;  %v3319_v47 = vld [vmem:[#allocation7 + $0x2e0] ss:$16 sps:$4 sm:$0xff]  }
 0x15b   :  { %1445 = vmatprep.mubr.bf16.mxu1 %v3931_v50  ;;  %2303 = vmatpush1.bf16.msra.mxu0 %v3283_v22  ;;  %v3327_v50 = vld [vmem:[#allocation7 + $0x2c4] ss:$16 sps:$4 sm:$0xff]  }
 0x15c   :  { %2304 = vmatprep.subr.bf16.mxu0 %v3288_v1  ;;  %2368 = vmatpush1.bf16.msra.mxu1 %v3319_v47 }
 0x15d   :  { %2369 = vmatprep.subr.bf16.mxu1 %v3327_v50 }
 0x15f   :  { %2305 = vmatpush1.bf16.msra.mxu0 %v3286_v59 }
 0x160   :  { %2306 = vmatprep.subr.bf16.mxu0 %v3291_v60  ;;  %2370 = vmatpush1.bf16.msra.mxu1 %v3325_v52 }
 0x161   :  { %1373 = vmatmul.mubr.bf16.gmra.mxu0 %v3925_v45  ;;  %v3298_v45 = vld [vmem:[#allocation7 + $0x1c0] ss:$16 sps:$4 sm:$0xff]   ;;  %2371 = vmatprep.subr.bf16.mxu1 %v3333_v53 }
 0x162   :  { %1446 = vmatmul.mubr.bf16.gmra.mxu1 %v3929_v49  ;;  %v3303_v49 = vld [vmem:[#allocation7 + $0x1a4] ss:$16 sps:$4 sm:$0xff]  }
 0x163   :  { %2307 = vmatpush1.bf16.msra.mxu0 %v3289_v15 }
 0x164   :  { %2308 = vmatprep.subr.bf16.mxu0 %v3294_v28  ;;  %2372 = vmatpush1.bf16.msra.mxu1 %v3331_v54 }
 0x165   :  { %2373 = vmatprep.subr.bf16.mxu1 %v3339_v56 }
 0x167   :  { %2309 = vmatpush1.bf16.msra.mxu0 %v3292_v13 }
 0x168   :  { %2310 = vmatprep.subr.bf16.mxu0 %v3297_v19  ;;  %2374 = vmatpush1.bf16.msra.mxu1 %v3337_v55 }
 0x169   :  { %2375 = vmatprep.subr.bf16.mxu1 %v3345_v62 }
 0x16b   :  { %2311 = vmatpush2.bf16.msra.mxu0 %v3295_v48 }
 0x16c   :  { %2312 = vmatprep.subr.bf16.mxu0 %v3300_v51  ;;  %2376 = vmatpush1.bf16.msra.mxu1 %v3343_v61 }
 0x16d   :  { %2377 = vmatprep.subr.bf16.mxu1 %v3351_v0 }
 0x16f   :  { %2313 = vmatpush2.bf16.msra.mxu0 %v3298_v45 }
 0x170   :  { %2314 = vmatprep.subr.bf16.mxu0 %v3303_v49  ;;  %2378 = vmatpush1.bf16.msra.mxu1 %v3349_v26 }
 0x171   :  { %2379 = vmatprep.subr.bf16.mxu1 %v3357_v4 }
 0x173   :  { %2315 = vmatpush2.bf16.msra.mxu0 %v3301_v57 }
 0x174   :  { %2316 = vmatprep.subr.bf16.mxu0 %v3306_v58  ;;  %2380 = vmatpush1.bf16.msra.mxu1 %v3355_v3 }
 0x175   :  { %2381 = vmatprep.subr.bf16.mxu1 %v3363_v6 }
 0x177   :  { %2317 = vmatpush2.bf16.msra.mxu0 %v3304_v63 }
 0x178   :  { %2318 = vmatprep.subr.bf16.mxu0 %v3309_v23  ;;  %2382 = vmatpush1.bf16.msra.mxu1 %v3361_v25 }
 0x179   :  { %2383 = vmatprep.subr.bf16.mxu1 %v3369_v10 }
 0x17b   :  { %2319 = vmatpush2.bf16.msra.mxu0 %v3307_v2 }
 0x17c   :  { %2320 = vmatprep.subr.bf16.mxu0 %v3312_v31  ;;  %2384 = vmatpush2.bf16.msra.mxu1 %v3367_v9 }
 0x17d   :  { %2385 = vmatprep.subr.bf16.mxu1 %v3375_v16 }
 0x17f   :  { %2321 = vmatpush2.bf16.msra.mxu0 %v3310_v24 }
 0x180   :  { %2322 = vmatprep.subr.bf16.mxu0 %v3315_v5  ;;  %2386 = vmatpush2.bf16.msra.mxu1 %v3373_v14 }
 0x181   :  { %2387 = vmatprep.subr.bf16.mxu1 %v3381_v27 }
 0x183   :  { %2323 = vmatpush2.bf16.msra.mxu0 %v3313_v7 }
 0x184   :  { %2324 = vmatprep.subr.bf16.mxu0 %v3318_v8  ;;  %2388 = vmatpush2.bf16.msra.mxu1 %v3379_v29 }
 0x185   :  { %2389 = vmatprep.subr.bf16.mxu1 %v3387_v30 }
 0x187   :  { %2325 = vmatpush2.bf16.msra.mxu0 %v3316_v11 }
 0x188   :  { %2440 = vmatprep.subr.bf16.mxu0 %v3324_v12  ;;  %2390 = vmatpush2.bf16.msra.mxu1 %v3385_v32 }
 0x189   :  { %2391 = vmatprep.subr.bf16.mxu1 %v3393_v34 }
 0x18c   :  { %2392 = vmatpush2.bf16.msra.mxu1 %v3391_v35 }
 0x18d   :  { %2393 = vmatprep.subr.bf16.mxu1 %v3399_v36 }
 0x190   :  { %2394 = vmatpush2.bf16.msra.mxu1 %v3397_v37 }
 0x191   :  { %2395 = vmatprep.subr.bf16.mxu1 %v3405_v39 }
 0x194   :  { %2396 = vmatpush2.bf16.msra.mxu1 %v3403_v40 }
 0x195   :  { %2397 = vmatprep.subr.bf16.mxu1 %v3411_v41 }
 0x198   :  { %2398 = vmatpush2.bf16.msra.mxu1 %v3409_v42 }
 0x199   :  { %2513 = vmatprep.subr.bf16.mxu1 %v3417_v43  ;;  %v3322_v43 = vld [vmem:[#allocation7 + $0xe8] ss:$16 sps:$4 sm:$0xff]  }
 0x1c9   :  { %v1198_v22 = vpop.f32.mrf.mxu0 }
 0x1ca   :  { %v1271_v1 = vpop.f32.mrf.mxu1  ;;  %v1199_v28 = vadd.f32 %v1198_v22, %v3964_v38 }
 0x1cb   :  { %v1200_v59 = vpop.f32.mrf.mxu0 }
 0x1cc   :  { %v1201_v60 = vadd.f32 %v1200_v59, %v3960_v33  ;;  %v1273_v15 = vpop.f32.mrf.mxu1  ;;  %v1272_v45 = vadd.f32 %v1271_v1, %v1199_v28  ;;  %v3330_v59 = vld [vmem:[#allocation7 + $0xcc] ss:$16 sps:$4 sm:$0xff]  }
 0x1cd   :  { %v1202_v13 = vpop.f32.mrf.mxu0 }
 0x1ce   :  { %v1274_v46 = vadd.f32 %v1273_v15, %v1201_v60  ;;  %v1203_v19 = vadd.f32 %v1202_v13, %v3964_v38  ;;  %v1275_v47 = vpop.f32.mrf.mxu1 }
 0x1cf   :  { %v1204_v48 = vpop.f32.mrf.mxu0 }
 0x1d0   :  { %v1276_v50 = vadd.f32 %v1275_v47, %v1203_v19  ;;  %v1205_v51 = vadd.f32 %v1204_v48, %v3960_v33  ;;  %v1277_v52 = vpop.f32.mrf.mxu1  ;;  %3527 = vtanh.f32 %v1274_v46 }
 0x1d1   :  { %v1208_v53 = vpop.f32.mrf.mxu0 }
 0x1d2   :  { %v1278_v49 = vadd.f32 %v1277_v52, %v1205_v51  ;;  %v1209_v54 = vadd.f32 %v1208_v53, %v3964_v38  ;;  %v1281_v55 = vpop.f32.mrf.mxu1  ;;  %3529 = vtanh.f32 %v1276_v50  ;;  %v3328_v51 = vld [vmem:[#allocation7 + $0xc8] ss:$16 sps:$4 sm:$0xff]   ;;  %v3336_v53 = vld [vmem:[#allocation7 + $0xac] ss:$16 sps:$4 sm:$0xff]  }
 0x1d3   :  { %v1210_v56 = vpop.f32.mrf.mxu0 }
 0x1d4   :  { %3531 = vtanh.f32 %v1278_v49  ;;  %v1211_v57 = vadd.f32 %v1210_v56, %v3960_v33  ;;  %v1282_v58 = vadd.f32 %v1281_v55, %v1209_v54  ;;  %v1283_v61 = vpop.f32.mrf.mxu1 }
 0x1d5   :  { %3533 = vtanh.f32 %v1272_v45  ;;  %v1212_v62 = vpop.f32.mrf.mxu0 }
 0x1d6   :  { %v1213_v63 = vadd.f32 %v1212_v62, %v3964_v38  ;;  %v1284_v23 = vadd.f32 %v1283_v61, %v1211_v57  ;;  %v1285_v26 = vpop.f32.mrf.mxu1  ;;  %3535 = vtanh.f32 %v1282_v58  ;;  %v3334_v61 = vld [vmem:[#allocation7 + $0xa8] ss:$16 sps:$4 sm:$0xff]   ;;  %v3342_v62 = vld [vmem:[#allocation7 + $0x8c] ss:$16 sps:$4 sm:$0xff]  }
 0x1d7   :  { %v1214_v0 = vpop.f32.mrf.mxu0 }
 0x1d8   :  { %v1215_v2 = vadd.f32 %v1214_v0, %v3960_v33  ;;  %v1286_v31 = vadd.f32 %v1285_v26, %v1213_v63  ;;  %v1287_v3 = vpop.f32.mrf.mxu1  ;;  %3537 = vtanh.f32 %v1284_v23  ;;  %v3340_v23 = vld [vmem:[#allocation7 + $0x88] ss:$16 sps:$4 sm:$0xff]   ;;  %v3348_v0 = vld [vmem:[#allocation7 + $0x6c] ss:$16 sps:$4 sm:$0xff]  }
 0x1d9   :  { %v1218_v4 = vpop.f32.mrf.mxu0 }
 0x1da   :  { %3539 = vtanh.f32 %v1286_v31  ;;  %v1219_v24 = vadd.f32 %v1218_v4, %v3964_v38  ;;  %v1288_v5 = vadd.f32 %v1287_v3, %v1215_v2  ;;  %v1291_v25 = vpop.f32.mrf.mxu1  ;;  %v3346_v4 = vld [vmem:[#allocation7 + $0x68] ss:$16 sps:$4 sm:$0xff]  }
 0x1db   :  { %v1220_v6 = vpop.f32.mrf.mxu0 }
 0x1dc   :  { %3541 = vtanh.f32 %v1288_v5  ;;  %v1221_v7 = vadd.f32 %v1220_v6, %v3960_v33  ;;  %v1292_v8 = vadd.f32 %v1291_v25, %v1219_v24  ;;  %v1293_v9 = vpop.f32.mrf.mxu1  ;;  %v3354_v24 = vld [vmem:[#allocation7 + $0x4c] ss:$16 sps:$4 sm:$0xff]   ;;  %v3352_v6 = vld [vmem:[#allocation7 + $0x48] ss:$16 sps:$4 sm:$0xff]  }
 0x1dd   :  { %v1222_v10 = vpop.f32.mrf.mxu0  ;;  %v3528_v16 = vpop.eup %3527 }
 0x1de   :  { %v1223_v11 = vadd.f32 %v1222_v10, %v3964_v38  ;;  %v1294_v12 = vadd.f32 %v1293_v9, %v1221_v7  ;;  %v1295_v14 = vpop.f32.mrf.mxu1  ;;  %3543 = vtanh.f32 %v1292_v8  ;;  %v3360_v8 = vld [vmem:[#allocation7 + $0x2c] ss:$16 sps:$4 sm:$0xff]  }
 0x1df   :  { %v1224_v27 = vpop.f32.mrf.mxu0  ;;  %v3530_v29 = vpop.eup %3529 }
 0x1e0   :  { %v1225_v30 = vadd.f32 %v1224_v27, %v3960_v33  ;;  %v1296_v32 = vadd.f32 %v1295_v14, %v1223_v11  ;;  %v1297_v34 = vpop.f32.mrf.mxu1  ;;  %3545 = vtanh.f32 %v1294_v12  ;;  %v3358_v12 = vld [vmem:[#allocation7 + $0x28] ss:$16 sps:$4 sm:$0xff]   ;;  %v3366_v14 = vld [vmem:[#allocation7 + $0xc] ss:$16 sps:$4 sm:$0xff]  }
 0x1e1   :  { %v3532_v35 = vpop.eup %3531  ;;  %v1228_v36 = vpop.f32.mrf.mxu0  ;;  %v3372_v27 = vld [vmem:[#allocation7 + $0x1ec] ss:$16 sps:$4 sm:$0xff]  }
 0x1e2   :  { %v3534_v37 = vpop.eup %3533  ;;  %3547 = vtanh.f32 %v1296_v32  ;;  %v1229_v39 = vadd.f32 %v1228_v36, %v3964_v38  ;;  %v1298_v40 = vadd.f32 %v1297_v34, %v1225_v30  ;;  %v1301_v41 = vpop.f32.mrf.mxu1  ;;  %v3979_v42 = vpack.c.bf16 %v3532_v35, %v3528_v16  ;;  %v3364_v16 = vld [vmem:[#allocation7 + $0x8] ss:$16 sps:$4 sm:$0xff]   ;;  %v3378_v30 = vld [vmem:[#allocation7 + $0x1cc] ss:$16 sps:$4 sm:$0xff]  }
 0x1e3   :  { %v1230_v22 = vpop.f32.mrf.mxu0  ;;  %v3981_v1 = vpack.c.bf16 %v3530_v29, %v3534_v37  ;;  %v3536_v13 = vpop.eup %3535  ;;  %v3370_v29 = vld [vmem:[#allocation7 + $0x1e8] ss:$16 sps:$4 sm:$0xff]   ;;  %v3384_v34 = vld [vmem:[#allocation7 + $0x1ac] ss:$16 sps:$4 sm:$0xff]   ;;  %v4009_v35 = vrot.slane %v3956_v44, %v3843_v21  ;;  %v4013_v36 = vrot.slane %v3956_v44, %v3836_v18 }
 0x1e4   :  { %3549 = vtanh.f32 %v1298_v40  ;;  %v1231_v60 = vadd.f32 %v1230_v22, %v3960_v33  ;;  %v1302_v15 = vadd.f32 %v1301_v41, %v1229_v39  ;;  %2326 = vmatprep.mubr.bf16.mxu0 %v3979_v42  ;;  %v1303_v28 = vpop.f32.mrf.mxu1  ;;  %v3376_v32 = vld [vmem:[#allocation7 + $0x1c8] ss:$16 sps:$4 sm:$0xff]  }
 0x1e5   :  { %v1232_v46 = vpop.f32.mrf.mxu0  ;;  %2327 = vmatmul.mubr.bf16.vlgmr.msra.gmra.mxu0 %v3981_v1  ;;  %v3538_v19 = vpop.eup %3537  ;;  %v3382_v40 = vld [vmem:[#allocation7 + $0x1a8] ss:$16 sps:$4 sm:$0xff]  }
 0x1e6   :  { %v1233_v47 = vadd.f32 %v1232_v46, %v3964_v38  ;;  %v1304_v48 = vadd.f32 %v1303_v28, %v1231_v60  ;;  %2441 = vmatpush1.bf16.msra.mxu0 %v3322_v43  ;;  %v1305_v50 = vpop.f32.mrf.mxu1  ;;  %3551 = vtanh.f32 %v1302_v15  ;;  %v3388_v44 = vld [vmem:[#allocation7 + $0x188] ss:$16 sps:$4 sm:$0xff]  }
 0x1e7   :  { %v3540_v52 = vpop.eup %3539  ;;  %v1234_v45 = vpop.f32.mrf.mxu0  ;;  %2442 = vmatprep.subr.bf16.mxu0 %v3330_v59 }
 0x1e8   :  { %v1235_v49 = vadd.f32 %v1234_v45, %v3960_v33  ;;  %v1306_v54 = vadd.f32 %v1305_v50, %v1233_v47  ;;  %v1307_v55 = vpop.f32.mrf.mxu1  ;;  %3553 = vtanh.f32 %v1304_v48  ;;  %v3988_v57 = vpack.c.bf16 %v3540_v52, %v3536_v13 }
 0x1e9   :  { %v3542_v56 = vpop.eup %3541 }
 0x1ea   :  { %3555 = vtanh.f32 %v1306_v54  ;;  %v1308_v58 = vadd.f32 %v1307_v55, %v1235_v49  ;;  %2443 = vmatpush1.bf16.msra.mxu0 %v3328_v51  ;;  %v3990_v38 = vpack.c.bf16 %v3542_v56, %v3538_v19  ;;  %v3396_v19 = vld [vmem:[#allocation7 + $0x16c] ss:$16 sps:$4 sm:$0xff]   ;;  %v3394_v49 = vld [vmem:[#allocation7 + $0x168] ss:$16 sps:$4 sm:$0xff]  }
 0x1eb   :  { %2444 = vmatprep.subr.bf16.mxu0 %v3336_v53  ;;  %v3544_v63 = vpop.eup %3543  ;;  %v3402_v55 = vld [vmem:[#allocation7 + $0x14c] ss:$16 sps:$4 sm:$0xff]  }
 0x1ec   :  { %3557 = vtanh.f32 %v1308_v58  ;;  %2336 = vmatprep.mubr.bf16.mxu0 %v3990_v38 }
 0x1ed   :  { %2337 = vmatmul.mubr.bf16.gmra.mxu0 %v3988_v57  ;;  %v3546_v33 = vpop.eup %3545 }
 0x1ee   :  { %2445 = vmatpush1.bf16.msra.mxu0 %v3334_v61 }
 0x1ef   :  { %v3548_v26 = vpop.eup %3547  ;;  %2446 = vmatprep.subr.bf16.mxu0 %v3342_v62 }
 0x1f0   :  { %v3994_v31 = vpack.c.bf16 %v3548_v26, %v3544_v63  ;;  %v3400_v26 = vld [vmem:[#allocation7 + $0x148] ss:$16 sps:$4 sm:$0xff]  }
 0x1f1   :  { %v3550_v2 = vpop.eup %3549 }
 0x1f2   :  { %2447 = vmatpush1.bf16.msra.mxu0 %v3340_v23  ;;  %v3996_v3 = vpack.c.bf16 %v3550_v2, %v3546_v33  ;;  %v3408_v2 = vld [vmem:[#allocation7 + $0x12c] ss:$16 sps:$4 sm:$0xff]  }
 0x1f3   :  { %2448 = vmatprep.subr.bf16.mxu0 %v3348_v0  ;;  %v3552_v5 = vpop.eup %3551 }
 0x1f4   :  { %2346 = vmatprep.mubr.bf16.mxu0 %v3996_v3 }
 0x1f5   :  { %2347 = vmatmul.mubr.bf16.gmra.mxu0 %v3994_v31  ;;  %v3554_v25 = vpop.eup %3553 }
 0x1f6   :  { %2449 = vmatpush1.bf16.msra.mxu0 %v3346_v4 }
 0x1f7   :  { %v3556_v7 = vpop.eup %3555  ;;  %2450 = vmatprep.subr.bf16.mxu0 %v3354_v24 }
 0x1f8   :  { %v4000_v10 = vpack.c.bf16 %v3556_v7, %v3552_v5 }
 0x1f9   :  { %v3558_v9 = vpop.eup %3557 }
 0x1fa   :  { %2451 = vmatpush1.bf16.msra.mxu0 %v3352_v6  ;;  %v4002_v11 = vpack.c.bf16 %v3558_v9, %v3554_v25  ;;  %v3406_v9 = vld [vmem:[#allocation7 + $0x128] ss:$16 sps:$4 sm:$0xff]  }
 0x1fb   :  { %2452 = vmatprep.subr.bf16.mxu0 %v3360_v8 }
 0x1fc   :  { %2356 = vmatprep.mubr.bf16.mxu0 %v4002_v11 }
 0x1fd   :  { %2357 = vmatmul.mubr.bf16.gmra.mxu0 %v4000_v10 }
 0x1fe   :  { %2453 = vmatpush1.bf16.msra.mxu0 %v3358_v12  ;;  %2472 = vmatprep.mubr.bf16.mxu0 %v3979_v42  ;;  %v3390_v42 = vld [vmem:[#allocation7 + $0x18c] ss:$16 sps:$4 sm:$0xff]  }
 0x1ff   :  { %2454 = vmatprep.subr.bf16.mxu0 %v3366_v14  ;;  %v3414_v14 = vld [vmem:[#allocation7 + $0x10c] ss:$16 sps:$4 sm:$0xff]  }
 0x202   :  { %2455 = vmatpush1.bf16.msra.mxu0 %v3364_v16 }
 0x203   :  { %2456 = vmatprep.subr.bf16.mxu0 %v3372_v27 }
 0x206   :  { %2457 = vmatpush2.bf16.msra.mxu0 %v3370_v29 }
 0x207   :  { %2458 = vmatprep.subr.bf16.mxu0 %v3378_v30 }
 0x209   :  { %v1344_v37 = vpop.f32.mrf.mxu0 }
 0x20a   :  { %v1417_v39 = vpop.f32.mrf.mxu1  ;;  %2459 = vmatpush2.bf16.msra.mxu0 %v3376_v32  ;;  %v1345_v59 = vadd.f32 %v1344_v37, %v4013_v36 }
 0x20b   :  { %v1346_v41 = vpop.f32.mrf.mxu0  ;;  %2460 = vmatprep.subr.bf16.mxu0 %v3384_v34 }
 0x20c   :  { %v1347_v43 = vadd.f32 %v1346_v41, %v4009_v35  ;;  %v1419_v22 = vpop.f32.mrf.mxu1  ;;  %v1418_v51 = vadd.f32 %v1417_v39, %v1345_v59  ;;  %v3412_v39 = vld [vmem:[#allocation7 + $0x108] ss:$16 sps:$4 sm:$0xff]  }
 0x20d   :  { %v1348_v60 = vpop.f32.mrf.mxu0 }
 0x20e   :  { %v1420_v15 = vadd.f32 %v1419_v22, %v1347_v43  ;;  %v1349_v28 = vadd.f32 %v1348_v60, %v4013_v36  ;;  %v1421_v13 = vpop.f32.mrf.mxu1  ;;  %2461 = vmatpush2.bf16.msra.mxu0 %v3382_v40 }
 0x20f   :  { %v1350_v46 = vpop.f32.mrf.mxu0  ;;  %2462 = vmatprep.subr.bf16.mxu0 %v3390_v42 }
 0x210   :  { %v1422_v47 = vadd.f32 %v1421_v13, %v1349_v28  ;;  %v1351_v48 = vadd.f32 %v1350_v46, %v4009_v35  ;;  %v1423_v50 = vpop.f32.mrf.mxu1  ;;  %3559 = vtanh.f32 %v1420_v15 }
 0x211   :  { %v1354_v52 = vpop.f32.mrf.mxu0 }
 0x212   :  { %v1424_v45 = vadd.f32 %v1423_v50, %v1351_v48  ;;  %v1427_v53 = vpop.f32.mrf.mxu1  ;;  %2463 = vmatpush2.bf16.msra.mxu0 %v3388_v44  ;;  %3561 = vtanh.f32 %v1422_v47  ;;  %v1355_v61 = vadd.f32 %v1354_v52, %v4013_v36  ;;  %v3415_v47 = vld [vmem:[#allocation7 + $0x2e8] ss:$16 sps:$4 sm:$0xff]  }
 0x213   :  { %v1356_v54 = vpop.f32.mrf.mxu0  ;;  %2464 = vmatprep.subr.bf16.mxu0 %v3396_v19 }
 0x214   :  { %3563 = vtanh.f32 %v1424_v45  ;;  %v1357_v56 = vadd.f32 %v1356_v54, %v4009_v35  ;;  %v1429_v58 = vpop.f32.mrf.mxu1  ;;  %v1428_v25 = vadd.f32 %v1427_v53, %v1355_v61 }
 0x215   :  { %3565 = vtanh.f32 %v1418_v51  ;;  %v1358_v62 = vpop.f32.mrf.mxu0  ;;  %v3420_v51 = vld [vmem:[#allocation7 + $0x2cc] ss:$16 sps:$4 sm:$0xff]  }
 0x216   :  { %v1430_v63 = vadd.f32 %v1429_v58, %v1357_v56  ;;  %v1359_v33 = vadd.f32 %v1358_v62, %v4013_v36  ;;  %v1431_v23 = vpop.f32.mrf.mxu1  ;;  %2465 = vmatpush2.bf16.msra.mxu0 %v3394_v49  ;;  %v3418_v58 = vld [vmem:[#allocation7 + $0x2c8] ss:$16 sps:$4 sm:$0xff]  }
 0x217   :  { %v1360_v0 = vpop.f32.mrf.mxu0  ;;  %2466 = vmatprep.subr.bf16.mxu0 %v3402_v55 }
 0x218   :  { %v1432_v4 = vadd.f32 %v1431_v23, %v1359_v33  ;;  %v1361_v24 = vadd.f32 %v1360_v0, %v4009_v35  ;;  %v1433_v5 = vpop.f32.mrf.mxu1  ;;  %3567 = vtanh.f32 %v1430_v63  ;;  %v3423_v63 = vld [vmem:[#allocation7 + $0x2ac] ss:$16 sps:$4 sm:$0xff]  }
 0x219   :  { %v1364_v6 = vpop.f32.mrf.mxu0 }
 0x21a   :  { %v1434_v7 = vadd.f32 %v1433_v5, %v1361_v24  ;;  %v1437_v8 = vpop.f32.mrf.mxu1  ;;  %2467 = vmatpush2.bf16.msra.mxu0 %v3400_v26  ;;  %3569 = vtanh.f32 %v1432_v4  ;;  %v1365_v29 = vadd.f32 %v1364_v6, %v4013_v36  ;;  %v3421_v5 = vld [vmem:[#allocation7 + $0x2a8] ss:$16 sps:$4 sm:$0xff]  }
 0x21b   :  { %v1366_v12 = vpop.f32.mrf.mxu0  ;;  %2468 = vmatprep.subr.bf16.mxu0 %v3408_v2 }
 0x21c   :  { %3571 = vtanh.f32 %v1434_v7  ;;  %v1367_v16 = vadd.f32 %v1366_v12, %v4009_v35  ;;  %v1439_v27 = vpop.f32.mrf.mxu1  ;;  %v1438_v15 = vadd.f32 %v1437_v8, %v1365_v29  ;;  %v3429_v7 = vld [vmem:[#allocation7 + $0x26c] ss:$16 sps:$4 sm:$0xff]  }
 0x21d   :  { %3573 = vtanh.f32 %v1428_v25  ;;  %v1368_v30 = vpop.f32.mrf.mxu0  ;;  %v3560_v40 = vpop.eup %3559  ;;  %v3426_v25 = vld [vmem:[#allocation7 + $0x28c] ss:$16 sps:$4 sm:$0xff]  }
 0x21e   :  { %v1440_v32 = vadd.f32 %v1439_v27, %v1367_v16  ;;  %v1369_v34 = vadd.f32 %v1368_v30, %v4013_v36  ;;  %v1441_v37 = vpop.f32.mrf.mxu1  ;;  %2469 = vmatpush2.bf16.msra.mxu0 %v3406_v9  ;;  %v3427_v16 = vld [vmem:[#allocation7 + $0x268] ss:$16 sps:$4 sm:$0xff]   ;;  %v3432_v29 = vld [vmem:[#allocation7 + $0x24c] ss:$16 sps:$4 sm:$0xff]  }
 0x21f   :  { %v1370_v41 = vpop.f32.mrf.mxu0  ;;  %2470 = vmatprep.subr.bf16.mxu0 %v3414_v14  ;;  %v3562_v42 = vpop.eup %3561  ;;  %v3435_v30 = vld [vmem:[#allocation7 + $0x22c] ss:$16 sps:$4 sm:$0xff]  }
 0x220   :  { %v1442_v43 = vadd.f32 %v1441_v37, %v1369_v34  ;;  %v1371_v22 = vadd.f32 %v1370_v41, %v4009_v35  ;;  %v1443_v59 = vpop.f32.mrf.mxu1  ;;  %3575 = vtanh.f32 %v1440_v32 }
 0x221   :  { %v3564_v60 = vpop.eup %3563  ;;  %v1374_v28 = vpop.f32.mrf.mxu0 }
 0x222   :  { %v3566_v13 = vpop.eup %3565  ;;  %v1444_v44 = vadd.f32 %v1443_v59, %v1371_v22  ;;  %v1447_v46 = vpop.f32.mrf.mxu1  ;;  %2471 = vmatpush2.bf16.msra.mxu0 %v3412_v39  ;;  %v4027_v19 = vpack.c.bf16 %v3564_v60, %v3560_v40  ;;  %3577 = vtanh.f32 %v1442_v43  ;;  %v1375_v53 = vadd.f32 %v1374_v28, %v4013_v36  ;;  %v3433_v40 = vld [vmem:[#allocation7 + $0x228] ss:$16 sps:$4 sm:$0xff]   ;;  %v3444_v22 = vld [vmem:[#allocation7 + $0x3cc] ss:$16 sps:$4 sm:$0xff]  }
 0x223   :  { %v1376_v48 = vpop.f32.mrf.mxu0  ;;  %v4029_v50 = vpack.c.bf16 %v3562_v42, %v3566_v13  ;;  %v3438_v42 = vld [vmem:[#allocation7 + $0x20c] ss:$16 sps:$4 sm:$0xff]   ;;  %v3439_v43 = vld [vmem:[#allocation7 + $0x3e8] ss:$16 sps:$4 sm:$0xff]  }
 0x224   :  { %3579 = vtanh.f32 %v1444_v44  ;;  %v1377_v52 = vadd.f32 %v1376_v48, %v4009_v35  ;;  %v1449_v45 = vpop.f32.mrf.mxu1  ;;  %2399 = vmatprep.mubr.bf16.mxu1 %v4027_v19  ;;  %v1448_v2 = vadd.f32 %v1447_v46, %v1375_v53  ;;  %v3442_v59 = vld [vmem:[#allocation7 + $0x3c8] ss:$16 sps:$4 sm:$0xff]   ;;  %v3447_v60 = vld [vmem:[#allocation7 + $0x3ac] ss:$16 sps:$4 sm:$0xff]  }
 0x225   :  { %3581 = vtanh.f32 %v1438_v15  ;;  %v1378_v49 = vpop.f32.mrf.mxu0  ;;  %2400 = vmatmul.mubr.bf16.vlgmr.msra.gmra.mxu1 %v4029_v50  ;;  %2473 = vmatmul.mubr.bf16.vlgmr.msra.gmra.mxu0 %v3981_v1  ;;  %v3568_v61 = vpop.eup %3567  ;;  %v3445_v15 = vld [vmem:[#allocation7 + $0x3a8] ss:$16 sps:$4 sm:$0xff]   ;;  %v3450_v28 = vld [vmem:[#allocation7 + $0x38c] ss:$16 sps:$4 sm:$0xff]  }
 0x226   :  { %v1450_v54 = vadd.f32 %v1449_v45, %v1377_v52  ;;  %v1379_v55 = vadd.f32 %v1378_v49, %v4013_v36  ;;  %v1451_v56 = vpop.f32.mrf.mxu1  ;;  %2514 = vmatpush1.bf16.msra.mxu1 %v3415_v47  ;;  %2482 = vmatprep.mubr.bf16.mxu0 %v3990_v38  ;;  %v3453_v13 = vld [vmem:[#allocation7 + $0x36c] ss:$16 sps:$4 sm:$0xff]   ;;  %v3451_v44 = vld [vmem:[#allocation7 + $0x368] ss:$16 sps:$4 sm:$0xff]  }
 0x227   :  { %v1380_v62 = vpop.f32.mrf.mxu0  ;;  %2515 = vmatprep.subr.bf16.mxu1 %v3420_v51  ;;  %v3570_v33 = vpop.eup %3569  ;;  %v3456_v46 = vld [vmem:[#allocation7 + $0x34c] ss:$16 sps:$4 sm:$0xff]   ;;  %v3457_v48 = vld [vmem:[#allocation7 + $0x328] ss:$16 sps:$4 sm:$0xff]  }
 0x228   :  { %v1452_v23 = vadd.f32 %v1451_v56, %v1379_v55  ;;  %v1381_v26 = vadd.f32 %v1380_v62, %v4009_v35  ;;  %v1453_v4 = vpop.f32.mrf.mxu1  ;;  %3583 = vtanh.f32 %v1450_v54  ;;  %v3424_v35 = vld [vmem:[#allocation7 + $0x288] ss:$16 sps:$4 sm:$0xff]   ;;  %v3459_v47 = vld [vmem:[#allocation7 + $0x32c] ss:$16 sps:$4 sm:$0xff]  }
 0x229   :  { %v3572_v0 = vpop.eup %3571  ;;  %v3462_v51 = vld [vmem:[#allocation7 + $0x30c] ss:$16 sps:$4 sm:$0xff]   ;;  %v3460_v52 = vld [vmem:[#allocation7 + $0x308] ss:$16 sps:$4 sm:$0xff]  }
 0x22a   :  { %v3574_v1 = vpop.eup %3573  ;;  %v1454_v24 = vadd.f32 %v1453_v4, %v1381_v26  ;;  %2516 = vmatpush1.bf16.msra.mxu1 %v3418_v58  ;;  %v4039_v36 = vpack.c.bf16 %v3572_v0, %v3568_v61  ;;  %3585 = vtanh.f32 %v1452_v23 }
 0x22b   :  { %2517 = vmatprep.subr.bf16.mxu1 %v3423_v63  ;;  %v4041_v38 = vpack.c.bf16 %v3570_v33, %v3574_v1 }
 0x22c   :  { %3587 = vtanh.f32 %v1454_v24  ;;  %2409 = vmatprep.mubr.bf16.mxu1 %v4039_v36 }
 0x22d   :  { %3589 = vtanh.f32 %v1448_v2  ;;  %2410 = vmatmul.mubr.bf16.gmra.mxu1 %v4041_v38  ;;  %2483 = vmatmul.mubr.bf16.gmra.mxu0 %v3988_v57  ;;  %v3576_v6 = vpop.eup %3575  ;;  %v3430_v57 = vld [vmem:[#allocation7 + $0x248] ss:$16 sps:$4 sm:$0xff]  }
 0x22e   :  { %2518 = vmatpush1.bf16.msra.mxu1 %v3421_v5  ;;  %2492 = vmatprep.mubr.bf16.mxu0 %v3996_v3 }
 0x22f   :  { %2519 = vmatprep.subr.bf16.mxu1 %v3426_v25  ;;  %v3578_v8 = vpop.eup %3577 }
 0x231   :  { %v3580_v9 = vpop.eup %3579 }
 0x232   :  { %v3582_v12 = vpop.eup %3581  ;;  %2520 = vmatpush1.bf16.msra.mxu1 %v3424_v35  ;;  %v4047_v14 = vpack.c.bf16 %v3580_v9, %v3576_v6 }
 0x233   :  { %2521 = vmatprep.subr.bf16.mxu1 %v3429_v7  ;;  %v4049_v27 = vpack.c.bf16 %v3578_v8, %v3582_v12 }
 0x234   :  { %2419 = vmatprep.mubr.bf16.mxu1 %v4047_v14 }
 0x235   :  { %2420 = vmatmul.mubr.bf16.gmra.mxu1 %v4049_v27  ;;  %2493 = vmatmul.mubr.bf16.gmra.mxu0 %v3994_v31  ;;  %v3584_v3 = vpop.eup %3583  ;;  %v3436_v31 = vld [vmem:[#allocation7 + $0x208] ss:$16 sps:$4 sm:$0xff]  }
 0x236   :  { %2522 = vmatpush1.bf16.msra.mxu1 %v3427_v16  ;;  %2502 = vmatprep.mubr.bf16.mxu0 %v4002_v11  ;;  %v3441_v11 = vld [vmem:[#allocation7 + $0x3ec] ss:$16 sps:$4 sm:$0xff]  }
 0x237   :  { %2523 = vmatprep.subr.bf16.mxu1 %v3432_v29  ;;  %v3586_v32 = vpop.eup %3585 }
 0x239   :  { %v3588_v34 = vpop.eup %3587 }
 0x23a   :  { %v3590_v37 = vpop.eup %3589  ;;  %2524 = vmatpush1.bf16.msra.mxu1 %v3430_v57  ;;  %v1503_v39 = vpack.c.bf16 %v3588_v34, %v3584_v3 }
 0x23b   :  { %2525 = vmatprep.subr.bf16.mxu1 %v3435_v30  ;;  %v1502_v41 = vpack.c.bf16 %v3586_v32, %v3590_v37 }
 0x23c   :  { %2429 = vmatprep.mubr.bf16.mxu1 %v1503_v39 }
 0x23d   :  { %2430 = vmatmul.mubr.bf16.gmra.mxu1 %v1502_v41  ;;  %2503 = vmatmul.mubr.bf16.gmra.mxu0 %v4000_v10  ;;  %v3448_v10 = vld [vmem:[#allocation7 + $0x388] ss:$16 sps:$4 sm:$0xff]  }
 0x23e   :  { %2526 = vmatpush1.bf16.msra.mxu1 %v3433_v40  ;;  %2545 = vmatprep.mubr.bf16.mxu1 %v4027_v19  ;;  %v3454_v19 = vld [vmem:[#allocation7 + $0x348] ss:$16 sps:$4 sm:$0xff]  }
 0x23f   :  { %2527 = vmatprep.subr.bf16.mxu1 %v3438_v42 }
 0x242   :  { %2528 = vmatpush1.bf16.msra.mxu1 %v3436_v31 }
 0x243   :  { %2529 = vmatprep.subr.bf16.mxu1 %v3441_v11 }
 0x246   :  { %2530 = vmatpush2.bf16.msra.mxu1 %v3439_v43 }
 0x247   :  { %2531 = vmatprep.subr.bf16.mxu1 %v3444_v22 }
 0x24a   :  { %2532 = vmatpush2.bf16.msra.mxu1 %v3442_v59 }
 0x24b   :  { %2533 = vmatprep.subr.bf16.mxu1 %v3447_v60 }
 0x24e   :  { %2534 = vmatpush2.bf16.msra.mxu1 %v3445_v15 }
 0x24f   :  { %2535 = vmatprep.subr.bf16.mxu1 %v3450_v28 }
 0x252   :  { %2536 = vmatpush2.bf16.msra.mxu1 %v3448_v10 }
 0x253   :  { %2537 = vmatprep.subr.bf16.mxu1 %v3453_v13 }
 0x256   :  { %2538 = vmatpush2.bf16.msra.mxu1 %v3451_v44 }
 0x257   :  { %2539 = vmatprep.subr.bf16.mxu1 %v3456_v46 }
 0x25a   :  { %2540 = vmatpush2.bf16.msra.mxu1 %v3454_v19 }
 0x25b   :  { %2541 = vmatprep.subr.bf16.mxu1 %v3459_v47 }
 0x25e   :  { %2542 = vmatpush2.bf16.msra.mxu1 %v3457_v48 }
 0x25f   :  { %2543 = vmatprep.subr.bf16.mxu1 %v3462_v51 }
 0x262   :  { %2544 = vmatpush2.bf16.msra.mxu1 %v3460_v52 }
 0x265   :  { %2546 = vmatmul.mubr.bf16.vlgmr.msra.gmra.mxu1 %v4029_v50  ;;  %v4065_v50 = vld [vmem:[%s4127_s6] sm:$0xf]  ;;  %s3747_s6 = smov [#allocation8]  }
 0x266   :  { %2555 = vmatprep.mubr.bf16.mxu1 %v4039_v36  ;;  %v4069_v62 = vrot.slane %v4065_v50, %v3834_v17  ;;  %v4073_v63 = vrot.slane %v4065_v50, %v3841_v20  ;;  %s2735_s26 = sshll.u32 %s3747_s6, 4  ;;  %s2736_s26 = int_to_ptr.vmem [resolvable:$true] %s2735_s26 }
 0x267   :  { %s3715_s27 = scalar_lea.vmem %s2736_s26, 2048  ;;  %p3720_p2 = scmp.lt.s32.totalorder %s2736_s26, %s2736_s26 }
 0x268   :  { %p3716_p1 = scmp.ne.s32.totalorder %s2736_s26, %s3715_s27  ;;  %p3721_p3 = scmp.lt.s32.totalorder %s3715_s27, %s3715_s27 }
 0x26a   :  { %p3722_p4 = por %p3721_p3, %p3720_p2 }
 0x26c   :  { %p3723_p5 = pnand %p3722_p4, %p3716_p1 }
 0x26d   :  { %2556 = vmatmul.mubr.bf16.gmra.mxu1 %v4041_v38 }
 0x26e   :  { %2565 = vmatprep.mubr.bf16.mxu1 %v4047_v14 }
 0x275   :  { %2566 = vmatmul.mubr.bf16.gmra.mxu1 %v4049_v27 }
 0x276   :  { %2575 = vmatprep.mubr.bf16.mxu1 %v1503_v39 }
 0x27d   :  { %2576 = vmatmul.mubr.bf16.gmra.mxu1 %v1502_v41 }
 0x2a5   :  { %v2328_v45 = vpop.f32.mrf.mxu0 }
 0x2a6   :  { %v2329_v23 = vadd.f32 %v2328_v45, %v4069_v62 }
 0x2a7   :  { %v2330_v53 = vpop.f32.mrf.mxu0 }
 0x2a8   :  { %v2331_v0 = vadd.f32 %v2330_v53, %v4073_v63 }
 0x2a9   :  { %v2332_v49 = vpop.f32.mrf.mxu0 }
 0x2aa   :  { %v2333_v24 = vadd.f32 %v2332_v49, %v4069_v62 }
 0x2ab   :  { %v2334_v54 = vpop.f32.mrf.mxu0 }
 0x2ac   :  { %v2335_v17 = vadd.f32 %v2334_v54, %v4073_v63 }
 0x2ad   :  { %v2338_v55 = vpop.f32.mrf.mxu0 }
 0x2ae   :  { %v2339_v35 = vadd.f32 %v2338_v55, %v4069_v62 }
 0x2af   :  { %v2340_v56 = vpop.f32.mrf.mxu0 }
 0x2b0   :  { %v2341_v8 = vadd.f32 %v2340_v56, %v4073_v63 }
 0x2b1   :  { %v2342_v58 = vpop.f32.mrf.mxu0 }
 0x2b2   :  { %v2343_v16 = vadd.f32 %v2342_v58, %v4069_v62 }
 0x2b3   :  { %v2344_v61 = vpop.f32.mrf.mxu0 }
 0x2b4   :  { %v2345_v57 = vadd.f32 %v2344_v61, %v4073_v63 }
 0x2b5   :  { %v2348_v33 = vpop.f32.mrf.mxu0 }
 0x2b6   :  { %v2349_v34 = vadd.f32 %v2348_v33, %v4069_v62 }
 0x2b7   :  { %v2350_v4 = vpop.f32.mrf.mxu0 }
 0x2b8   :  { %v2351_v41 = vadd.f32 %v2350_v4, %v4073_v63 }
 0x2b9   :  { %v2352_v20 = vpop.f32.mrf.mxu0 }
 0x2ba   :  { %v2353_v22 = vadd.f32 %v2352_v20, %v4069_v62 }
 0x2bb   :  { %v2354_v12 = vpop.f32.mrf.mxu0 }
 0x2bc   :  { %v2355_v10 = vadd.f32 %v2354_v12, %v4073_v63 }
 0x2bd   :  { %v2358_v30 = vpop.f32.mrf.mxu0 }
 0x2be   :  { %v2359_v47 = vadd.f32 %v2358_v30, %v4069_v62 }
 0x2bf   :  { %v2360_v11 = vpop.f32.mrf.mxu0 }
 0x2c0   :  { %v2361_v53 = vadd.f32 %v2360_v11, %v4073_v63 }
 0x2c1   :  { %v2362_v46 = vpop.f32.mrf.mxu0 }
 0x2c2   :  { %v2363_v58 = vadd.f32 %v2362_v46, %v4069_v62 }
 0x2c3   :  { %v2364_v55 = vpop.f32.mrf.mxu0 }
 0x2e5   :  { %v2401_v26 = vpop.f32.mrf.mxu1 }
 0x2e6   :  { %v2402_v2 = vadd.f32 %v2401_v26, %v2329_v23 }
 0x2e7   :  { %v2403_v1 = vpop.f32.mrf.mxu1 }
 0x2e8   :  { %v2404_v36 = vadd.f32 %v2403_v1, %v2331_v0  ;;  %3591 = vtanh.f32 %v2402_v2  ;;  %v2365_v0 = vadd.f32 %v2364_v55, %v4073_v63  ;;  %v2474_v1 = vpop.f32.mrf.mxu0 }
 0x2e9   :  { %v2405_v5 = vpop.f32.mrf.mxu1 }
 0x2ea   :  { %3593 = vtanh.f32 %v2404_v36  ;;  %v2406_v38 = vadd.f32 %v2405_v5, %v2333_v24 }
 0x2eb   :  { %v2407_v25 = vpop.f32.mrf.mxu1 }
 0x2ec   :  { %v2408_v6 = vadd.f32 %v2407_v25, %v2335_v17  ;;  %3595 = vtanh.f32 %v2406_v38  ;;  %v2476_v38 = vpop.f32.mrf.mxu0 }
 0x2ed   :  { %v2411_v7 = vpop.f32.mrf.mxu1 }
 0x2ee   :  { %3597 = vtanh.f32 %v2408_v6  ;;  %v2412_v9 = vadd.f32 %v2411_v7, %v2339_v35  ;;  %v2478_v6 = vpop.f32.mrf.mxu0 }
 0x2ef   :  { %v2413_v14 = vpop.f32.mrf.mxu1 }
 0x2f0   :  { %v2414_v27 = vadd.f32 %v2413_v14, %v2341_v8  ;;  %3599 = vtanh.f32 %v2412_v9  ;;  %v2480_v9 = vpop.f32.mrf.mxu0 }
 0x2f1   :  { %v2415_v29 = vpop.f32.mrf.mxu1 }
 0x2f2   :  { %3601 = vtanh.f32 %v2414_v27  ;;  %v2416_v3 = vadd.f32 %v2415_v29, %v2343_v16  ;;  %v2484_v27 = vpop.f32.mrf.mxu0 }
 0x2f3   :  { %v2417_v32 = vpop.f32.mrf.mxu1 }
 0x2f4   :  { %v2418_v37 = vadd.f32 %v2417_v32, %v2345_v57  ;;  %3603 = vtanh.f32 %v2416_v3  ;;  %v2486_v57 = vpop.f32.mrf.mxu0  ;;  %v4093_v32 = vrot.slane %v4065_v50, %v3836_v18 }
 0x2f5   :  { %v2421_v39 = vpop.f32.mrf.mxu1  ;;  %v3592_v40 = vpop.eup %3591 }
 0x2f6   :  { %3605 = vtanh.f32 %v2418_v37  ;;  %v2422_v42 = vadd.f32 %v2421_v39, %v2349_v34  ;;  %v2488_v3 = vpop.f32.mrf.mxu0  ;;  %v4097_v34 = vrot.slane %v4065_v50, %v3843_v21  ;;  %v2475_v39 = vadd.f32 %v2474_v1, %v4093_v32 }
 0x2f7   :  { %v3594_v31 = vpop.eup %3593  ;;  %v2423_v43 = vpop.f32.mrf.mxu1 }
 0x2f8   :  { %v3040_v59 = vpack.c.bf16 %v3594_v31, %v3592_v40  ;;  %v2424_v60 = vadd.f32 %v2423_v43, %v2351_v41  ;;  %3607 = vtanh.f32 %v2422_v42  ;;  %v2490_v30 = vpop.f32.mrf.mxu0  ;;  %v2477_v41 = vadd.f32 %v2476_v38, %v4097_v34 }
 0x2f9   :  { %v2425_v15 = vpop.f32.mrf.mxu1  ;;  %v3596_v28 = vpop.eup %3595  ;;  %v2479_v43 = vadd.f32 %v2478_v6, %v4093_v32  ;;  %v2481_v18 = vadd.f32 %v2480_v9, %v4097_v34 }
 0x2fa   :  { %2714 = vst [vmem:[#allocation8] sm:$0xff] %v3040_v59  ;;  %3609 = vtanh.f32 %v2424_v60  ;;  %v2426_v13 = vadd.f32 %v2425_v15, %v2353_v22  ;;  %v2494_v37 = vpop.f32.mrf.mxu0  ;;  %v2485_v15 = vadd.f32 %v2484_v27, %v4093_v32 }
 0x2fb   :  { %v3598_v44 = vpop.eup %3597  ;;  %v2427_v19 = vpop.f32.mrf.mxu1 }
 0x2fc   :  { %v3042_v48 = vpack.c.bf16 %v3598_v44, %v3596_v28  ;;  %v2428_v51 = vadd.f32 %v2427_v19, %v2355_v10  ;;  %3611 = vtanh.f32 %v2426_v13  ;;  %v2496_v31 = vpop.f32.mrf.mxu0  ;;  %v2487_v13 = vadd.f32 %v2486_v57, %v4097_v34 }
 0x2fd   :  { %v2431_v52 = vpop.f32.mrf.mxu1  ;;  %v3600_v45 = vpop.eup %3599 }
 0x2fe   :  { %2716 = vst [vmem:[#allocation8 + $0x10] sm:$0xff] %v3042_v48  ;;  %3613 = vtanh.f32 %v2428_v51  ;;  %v2432_v49 = vadd.f32 %v2431_v52, %v2359_v47  ;;  %v2498_v21 = vpop.f32.mrf.mxu0  ;;  %v2489_v47 = vadd.f32 %v2488_v3, %v4093_v32  ;;  %v2491_v52 = vadd.f32 %v2490_v30, %v4097_v34 }
 0x2ff   :  { %v3602_v54 = vpop.eup %3601  ;;  %v2433_v56 = vpop.f32.mrf.mxu1 }
 0x300   :  { %v3044_v61 = vpack.c.bf16 %v3602_v54, %v3600_v45  ;;  %v2434_v33 = vadd.f32 %v2433_v56, %v2361_v53  ;;  %3615 = vtanh.f32 %v2432_v49  ;;  %v2500_v46 = vpop.f32.mrf.mxu0  ;;  %v2495_v54 = vadd.f32 %v2494_v37, %v4093_v32 }
 0x301   :  { %v2435_v23 = vpop.f32.mrf.mxu1  ;;  %v3604_v26 = vpop.eup %3603 }
 0x302   :  { %2718 = vst [vmem:[#allocation8 + $0x20] sm:$0xff] %v3044_v61  ;;  %3617 = vtanh.f32 %v2434_v33  ;;  %v2436_v2 = vadd.f32 %v2435_v23, %v2363_v58  ;;  %v2504_v53 = vpop.f32.mrf.mxu0  ;;  %v2497_v61 = vadd.f32 %v2496_v31, %v4097_v34 }
 0x303   :  { %v3606_v4 = vpop.eup %3605  ;;  %v2437_v24 = vpop.f32.mrf.mxu1 }
 0x304   :  { %v3046_v36 = vpack.c.bf16 %v3606_v4, %v3604_v26  ;;  %v2438_v5 = vadd.f32 %v2437_v24, %v2365_v0  ;;  %3619 = vtanh.f32 %v2436_v2  ;;  %v2506_v26 = vpop.f32.mrf.mxu0  ;;  %v2499_v2 = vadd.f32 %v2498_v21, %v4093_v32 }
 0x305   :  { %v3608_v17 = vpop.eup %3607 }
 0x306   :  { %2720 = vst [vmem:[#allocation8 + $0x30] sm:$0xff] %v3046_v36  ;;  %3621 = vtanh.f32 %v2438_v5  ;;  %v2501_v5 = vadd.f32 %v2500_v46, %v4097_v34  ;;  %v2508_v38 = vpop.f32.mrf.mxu0 }
 0x307   :  { %v3610_v62 = vpop.eup %3609  ;;  %v2509_v27 = vadd.f32 %v2508_v38, %v4093_v32 }
 0x308   :  { %v3048_v20 = vpack.c.bf16 %v3610_v62, %v3608_v17 }
 0x309   :  { %v3612_v25 = vpop.eup %3611 }
 0x30a   :  { %2722 = vst [vmem:[#allocation8 + $0x40] sm:$0xff] %v3048_v20 }
 0x30b   :  { %v3614_v35 = vpop.eup %3613 }
 0x30c   :  { %v3050_v63 = vpack.c.bf16 %v3614_v35, %v3612_v25  ;;  %v2505_v25 = vadd.f32 %v2504_v53, %v4093_v32 }
 0x30d   :  { %v3616_v7 = vpop.eup %3615 }
 0x30e   :  { %2724 = vst [vmem:[#allocation8 + $0x50] sm:$0xff] %v3050_v63 }
 0x30f   :  { %v3618_v8 = vpop.eup %3617 }
 0x310   :  { %v3052_v12 = vpack.c.bf16 %v3618_v8, %v3616_v7  ;;  %v2507_v8 = vadd.f32 %v2506_v26, %v4097_v34 }
 0x311   :  { %v3620_v14 = vpop.eup %3619 }
 0x312   :  { %2726 = vst [vmem:[#allocation8 + $0x60] sm:$0xff] %v3052_v12 }
 0x313   :  { %v3622_v16 = vpop.eup %3621 }
 0x314   :  { %v3054_v29 = vpack.c.bf16 %v3622_v16, %v3620_v14  ;;  %v2510_v14 = vpop.f32.mrf.mxu0 }
 0x315   :  { %v2511_v37 = vadd.f32 %v2510_v14, %v4097_v34 }
 0x316   :  { %2728 = vst [vmem:[#allocation8 + $0x70] sm:$0xff] %v3054_v29 }
 0x325   :  { %v2547_v40 = vpop.f32.mrf.mxu1 }
 0x326   :  { %v2548_v42 = vadd.f32 %v2547_v40, %v2475_v39 }
 0x327   :  { %v2549_v11 = vpop.f32.mrf.mxu1 }
 0x328   :  { %v2550_v22 = vadd.f32 %v2549_v11, %v2477_v41  ;;  %3623 = vtanh.f32 %v2548_v42 }
 0x329   :  { %v2551_v59 = vpop.f32.mrf.mxu1 }
 0x32a   :  { %3625 = vtanh.f32 %v2550_v22  ;;  %v2552_v60 = vadd.f32 %v2551_v59, %v2479_v43 }
 0x32b   :  { %v2553_v50 = vpop.f32.mrf.mxu1 }
 0x32c   :  { %v2554_v28 = vadd.f32 %v2553_v50, %v2481_v18  ;;  %3627 = vtanh.f32 %v2552_v60 }
 0x32d   :  { %v2557_v10 = vpop.f32.mrf.mxu1 }
 0x32e   :  { %3629 = vtanh.f32 %v2554_v28  ;;  %v2558_v44 = vadd.f32 %v2557_v10, %v2485_v15 }
 0x32f   :  { %v2559_v19 = vpop.f32.mrf.mxu1 }
 0x330   :  { %v2560_v48 = vadd.f32 %v2559_v19, %v2487_v13  ;;  %3631 = vtanh.f32 %v2558_v44 }
 0x331   :  { %v2561_v51 = vpop.f32.mrf.mxu1 }
 0x332   :  { %3633 = vtanh.f32 %v2560_v48  ;;  %v2562_v45 = vadd.f32 %v2561_v51, %v2489_v47 }
 0x333   :  { %v2563_v49 = vpop.f32.mrf.mxu1 }
 0x334   :  { %v2564_v55 = vadd.f32 %v2563_v49, %v2491_v52  ;;  %3635 = vtanh.f32 %v2562_v45 }
 0x335   :  { %v2567_v56 = vpop.f32.mrf.mxu1  ;;  %v3624_v58 = vpop.eup %3623 }
 0x336   :  { %3637 = vtanh.f32 %v2564_v55  ;;  %v2568_v33 = vadd.f32 %v2567_v56, %v2495_v54 }
 0x337   :  { %v3626_v23 = vpop.eup %3625  ;;  %v2569_v0 = vpop.f32.mrf.mxu1 }
 0x338   :  { %v3041_v4 = vpack.c.bf16 %v3626_v23, %v3624_v58  ;;  %v2570_v1 = vadd.f32 %v2569_v0, %v2497_v61  ;;  %3639 = vtanh.f32 %v2568_v33 }
 0x339   :  { %v2571_v24 = vpop.f32.mrf.mxu1  ;;  %v3628_v36 = vpop.eup %3627 }
 0x33a   :  { %2715 = vst [vmem:[#allocation8 + $0x8] sm:$0xff] %v3041_v4  ;;  %3641 = vtanh.f32 %v2570_v1  ;;  %v2572_v17 = vadd.f32 %v2571_v24, %v2499_v2 }
 0x33b   :  { %v3630_v62 = vpop.eup %3629  ;;  %v2573_v20 = vpop.f32.mrf.mxu1 }
 0x33c   :  { %v3043_v35 = vpack.c.bf16 %v3630_v62, %v3628_v36  ;;  %v2574_v6 = vadd.f32 %v2573_v20, %v2501_v5  ;;  %3643 = vtanh.f32 %v2572_v17 }
 0x33d   :  { %v2577_v63 = vpop.f32.mrf.mxu1  ;;  %v3632_v7 = vpop.eup %3631 }
 0x33e   :  { %2717 = vst [vmem:[#allocation8 + $0x18] sm:$0xff] %v3043_v35  ;;  %3645 = vtanh.f32 %v2574_v6  ;;  %v2578_v9 = vadd.f32 %v2577_v63, %v2505_v25 }
 0x33f   :  { %v3634_v12 = vpop.eup %3633  ;;  %v2579_v16 = vpop.f32.mrf.mxu1 }
 0x340   :  { %v3045_v29 = vpack.c.bf16 %v3634_v12, %v3632_v7  ;;  %v2580_v57 = vadd.f32 %v2579_v16, %v2507_v8  ;;  %3647 = vtanh.f32 %v2578_v9 }
 0x341   :  { %v2581_v3 = vpop.f32.mrf.mxu1  ;;  %v3636_v30 = vpop.eup %3635 }
 0x342   :  { %2719 = vst [vmem:[#allocation8 + $0x28] sm:$0xff] %v3045_v29  ;;  %3649 = vtanh.f32 %v2580_v57  ;;  %v2582_v39 = vadd.f32 %v2581_v3, %v2509_v27 }
 0x343   :  { %v3638_v40 = vpop.eup %3637  ;;  %v2583_v41 = vpop.f32.mrf.mxu1 }
 0x344   :  { %v3047_v42 = vpack.c.bf16 %v3638_v40, %v3636_v30  ;;  %v2584_v31 = vadd.f32 %v2583_v41, %v2511_v37  ;;  %3651 = vtanh.f32 %v2582_v39 }
 0x345   :  { %v3640_v11 = vpop.eup %3639 }
 0x346   :  { %2721 = vst [vmem:[#allocation8 + $0x38] sm:$0xff] %v3047_v42  ;;  %3653 = vtanh.f32 %v2584_v31 }
 0x347   :  { %v3642_v43 = vpop.eup %3641 }
 0x348   :  { %v3049_v32 = vpack.c.bf16 %v3642_v43, %v3640_v11 }
 0x349   :  { %v3644_v22 = vpop.eup %3643 }
 0x34a   :  { %2723 = vst [vmem:[#allocation8 + $0x48] sm:$0xff] %v3049_v32 }
 0x34b   :  { %v3646_v59 = vpop.eup %3645 }
 0x34c   :  { %v3051_v18 = vpack.c.bf16 %v3646_v59, %v3644_v22 }
 0x34d   :  { %v3648_v60 = vpop.eup %3647 }
 0x34e   :  { %2725 = vst [vmem:[#allocation8 + $0x58] sm:$0xff] %v3051_v18 }
 0x34f   :  { %v3650_v34 = vpop.eup %3649 }
 0x350   :  { %v3053_v21 = vpack.c.bf16 %v3650_v34, %v3648_v60 }
 0x351   :  { %v3652_v50 = vpop.eup %3651 }
 0x352   :  { %2727 = vst [vmem:[#allocation8 + $0x68] sm:$0xff] %v3053_v21 }
 0x353   :  { %v3654_v15 = vpop.eup %3653 }
 0x354   :  { %v3055_v28 = vpack.c.bf16 %v3654_v15, %v3652_v50 }
 0x356   :  { %2729 = vst [vmem:[#allocation8 + $0x78] sm:$0xff] %v3055_v28 }
 0x357   :  { %3726 = shalt.err (!%p3723_p5)
}
 0x358   :  { %2741 = dma.vmem_to_hbm [thread:$0]  %s2736_s26, 2048, %s4128_s7, [#allocation4], %s3743_s29, %s3743_s29, %s3744_s30  }
 0x359   :  { %3739 = dma.done.wait [#allocation4], 2048  }
 0x35a   :  { %3740 = vsyncadd [#allocation4], 4294965248 }
 0x35b   :  { %2745 = vsyncpa [#allocation3], 1 }
 0x35c   :  { %2746 = vsyncpa [#allocation6], 1 }
 0x35d   :  { %2747 = vsyncpa [#allocation4], 1 }

</bundles_post_ra>
